<compile_context>
chip_gen: v7x
topology: tpu7x:2x2x1
jax: 0.10.0
libtpu: 0.0.40
codegen_flags: <defaults>
</compile_context>

<pallas_src>
import functools

import jax
import jax.numpy as jnp
from jax.experimental import pallas as pl
from jax.experimental.pallas import tpu as pltpu


def _round_up(x, m):
    return ((x + m - 1) // m) * m


def supcon_v2_kernel(f_ref, ft_ref, lab_r_ref, lab_c_ref, iou_ref, out_ref, *,
                     temperature, iou_threshold, n_valid):
    # f_ref:     (bm, Dp)      tile of (padded) features for this grid step's rows
    # ft_ref:    (Dp, Np)      transposed (padded) features, resident across steps
    # lab_r_ref: (bm, 1)       int32 labels for this row tile
    # lab_c_ref: (1, Np)       int32 labels for all columns
    # iou_ref:   (bm, 1)       f32 ious for this row tile
    # out_ref:   (1, 8, 128)   per-tile partial sums: [0,0,0]=sum(loss), [0,0,1]=sum(keep)

    # Full similarity row-block on the MXU, f32 accumulation.
    sim = jnp.dot(f_ref[...], ft_ref[...],
                  preferred_element_type=jnp.float32) * (1.0 / temperature)
    bm, n = sim.shape

    # Row-max subtraction (matches the torch code; the shift cancels in the
    # num/den ratio but keeps exp() in range).
    row_max = jnp.max(sim, axis=-1, keepdims=True)
    exp_sim = jnp.exp(sim - row_max)

    # Masks built from iota vs the static true N: off-diagonal, valid column,
    # same label.  Padded feature rows/cols are zeros so they only affect the
    # (cancelling) row max.
    row_ids = pl.program_id(0) * bm + jax.lax.broadcasted_iota(jnp.int32, (bm, n), 0)
    col_ids = jax.lax.broadcasted_iota(jnp.int32, (bm, n), 1)
    logits_mask = jnp.logical_and(row_ids != col_ids, col_ids < n_valid)   # (bm, n)
    label_eq = lab_r_ref[...] == lab_c_ref[...]                            # (bm,1)==(1,n)->(bm,n)
    pos_mask = jnp.logical_and(logits_mask, label_eq)

    num = jnp.sum(jnp.where(pos_mask, exp_sim, 0.0), axis=-1, keepdims=True)
    den = jnp.sum(jnp.where(logits_mask, exp_sim, 0.0), axis=-1, keepdims=True)
    pos_count = jnp.sum(pos_mask.astype(jnp.float32), axis=-1, keepdims=True)

    row_valid = row_ids[:, :1] < n_valid                                    # (bm, 1)
    keep = jnp.logical_and(
        jnp.logical_and(pos_count > 0.0, iou_ref[...] >= iou_threshold),
        row_valid)

    # log(1) = 0 for dropped / padded rows -> they contribute nothing.
    loss_rows = -jnp.log(jnp.where(keep, num / den, 1.0))                   # (bm, 1)
    loss_sum = jnp.sum(loss_rows)
    keep_sum = jnp.sum(keep.astype(jnp.float32))

    # Pack the two scalars into one full (8,128) tile -> unmasked lane-dense store.
    sub = jax.lax.broadcasted_iota(jnp.int32, (1, 8, 128), 1)
    lane = jax.lax.broadcasted_iota(jnp.int32, (1, 8, 128), 2)
    out_ref[...] = jnp.where(
        jnp.logical_and(sub == 0, lane == 0), loss_sum,
        jnp.where(jnp.logical_and(sub == 0, lane == 1), keep_sum, 0.0))


def supcon_loss_v2(features, labels, ious, *, temperature=0.2,
                   iou_threshold=0.5, block_m=128):
    """features: [N, D] f32; labels: [N] int; ious: [N] f32. Returns scalar loss."""
    features = jnp.asarray(features, jnp.float32)
    labels = jnp.asarray(labels).reshape(-1).astype(jnp.int32)
    ious = jnp.asarray(ious, jnp.float32).reshape(-1)

    n, d = features.shape
    bm = max(8, _round_up(block_m, 8))
    n_pad = _round_up(n, bm)
    d_pad = _round_up(d, 8)                    # sublane alignment for features^T
    if n_pad != n or d_pad != d:
        features = jnp.pad(features, ((0, n_pad - n), (0, d_pad - d)))
    if n_pad != n:
        labels = jnp.pad(labels, (0, n_pad - n), constant_values=-1)
        ious = jnp.pad(ious, (0, n_pad - n), constant_values=-1.0)

    features_t = features.T                    # [Dp, Np], transposed once outside the kernel
    lab_row = labels.reshape(n_pad, 1)
    lab_col = labels.reshape(1, n_pad)
    iou_col = ious.reshape(n_pad, 1)

    num_tiles = n_pad // bm
    kernel = functools.partial(supcon_v2_kernel,
                               temperature=float(temperature),
                               iou_threshold=float(iou_threshold),
                               n_valid=int(n))

    partial = pl.pallas_call(
        kernel,
        out_shape=jax.ShapeDtypeStruct((num_tiles, 8, 128), jnp.float32),
        grid_spec=pltpu.PrefetchScalarGridSpec(
            num_scalar_prefetch=0,
            grid=(num_tiles,),
            in_specs=[
                pl.BlockSpec((bm, d_pad), lambda i: (i, 0)),       # feature row tile
                pl.BlockSpec((d_pad, n_pad), lambda i: (0, 0)),    # features^T (resident)
                pl.BlockSpec((bm, 1), lambda i: (i, 0)),           # row labels
                pl.BlockSpec((1, n_pad), lambda i: (0, 0)),        # column labels
                pl.BlockSpec((bm, 1), lambda i: (i, 0)),           # row ious
            ],
            out_specs=pl.BlockSpec((1, 8, 128), lambda i: (i, 0, 0)),
        ),
        compiler_params=pltpu.CompilerParams(
            dimension_semantics=("parallel",)),
        cost_estimate=pl.CostEstimate(
            flops=int(2 * n_pad * n_pad * d_pad + 12 * n_pad * n_pad),
            transcendentals=int(n_pad * n_pad + n_pad),
            bytes_accessed=int(4 * (2 * n_pad * d_pad + 4 * n_pad
                                    + num_tiles * 8 * 128))),
    )(features, features_t, lab_row, lab_col, iou_col)

    # O(num_tiles) finish in the wrapper. Matches torch .mean(): 0/0 -> NaN if
    # nothing is kept.
    loss_sum = jnp.sum(partial[:, 0, 0])
    keep_sum = jnp.sum(partial[:, 0, 1])
    return loss_sum / keep_sum


def _reference(features, labels, ious, temperature, iou_threshold):
    labels = labels.reshape(-1, 1)
    label_mask = (labels == labels.T).astype(jnp.float32)
    sim = jnp.matmul(features, features.T,
                     precision=jax.lax.Precision.HIGHEST) / temperature
    sim = sim - jnp.max(sim, axis=1, keepdims=True)
    n = features.shape[0]
    logits_mask = 1.0 - jnp.eye(n, dtype=jnp.float32)
    exp_sim = jnp.exp(sim)
    mask = logits_mask * label_mask
    keep = (jnp.sum(mask, axis=1) != 0) & (ious >= iou_threshold)
    num = jnp.sum(exp_sim * mask, axis=1)
    den = jnp.sum(exp_sim * logits_mask, axis=1)
    log_prob = jnp.where(keep, jnp.log(num / den), 0.0)
    return -jnp.sum(log_prob) / jnp.sum(keep)


if __name__ == "__main__":
    # Small shapes consistent with the module's use in fsdet:
    # N proposals with 128-d L2-normalized contrastive features.
    N, D = 256, 128
    temperature, iou_threshold = 0.2, 0.5

    key = jax.random.PRNGKey(0)
    kf, kl, ki = jax.random.split(key, 3)
    feats = jax.random.normal(kf, (N, D), dtype=jnp.float32)
    feats = feats / jnp.linalg.norm(feats, axis=1, keepdims=True)
    labels = jax.random.randint(kl, (N,), 0, 8, dtype=jnp.int32)
    ious = jax.random.uniform(ki, (N,), dtype=jnp.float32)

    out = supcon_loss_v2(feats, labels, ious,
                         temperature=temperature, iou_threshold=iou_threshold)
    out = jax.block_until_ready(out)

    ref = _reference(feats, labels, ious, temperature, iou_threshold)
    assert out.shape == ()
    assert bool(jnp.isfinite(out)), "loss is not finite"
    assert jnp.allclose(out, ref, atol=2e-2, rtol=2e-2), (float(out), float(ref))

    print("KERNEL_OK")
</pallas_src>

<mosaic_0001>
module attributes {stable_mosaic.version = 11 : i64} {
  func.func @supcon_v2_kernel(%arg0: i32, %arg1: memref<128x128xf32, #tpu.memory_space<vmem>>, %arg2: memref<128x256xf32, #tpu.memory_space<vmem>>, %arg3: memref<128x1xi32, #tpu.memory_space<vmem>>, %arg4: memref<1x256xi32, #tpu.memory_space<vmem>>, %arg5: memref<128x1xf32, #tpu.memory_space<vmem>>, %arg6: memref<1x8x128xf32, #tpu.memory_space<vmem>>) attributes {dimension_semantics = [#tpu.dimension_semantics<parallel>], iteration_bounds = array<i64: 2>, scalar_prefetch = 0 : i64, scratch_operands = 0 : i64, tpu.core_type = #tpu.core_type<tc>, window_params = [{transform_indices = @transform_0, window_bounds = array<i64: 128, 128>}, {pipeline_mode = #tpu.pipeline_mode<synchronous>, transform_indices = @transform_1, window_bounds = array<i64: 128, 256>}, {transform_indices = @transform_2, window_bounds = array<i64: 128, 1>}, {pipeline_mode = #tpu.pipeline_mode<synchronous>, transform_indices = @transform_3, window_bounds = array<i64: 1, 256>}, {transform_indices = @transform_4, window_bounds = array<i64: 128, 1>}, {transform_indices = @transform_5, window_bounds = array<i64: 1, 8, 128>}]} {
    %c0 = arith.constant 0 : index
    %c0_0 = arith.constant 0 : index
    %0 = vector.load %arg1[%c0, %c0_0] : memref<128x128xf32, #tpu.memory_space<vmem>>, vector<128x128xf32>
    %c0_1 = arith.constant 0 : index
    %c0_2 = arith.constant 0 : index
    %1 = vector.load %arg2[%c0_1, %c0_2] : memref<128x256xf32, #tpu.memory_space<vmem>>, vector<128x256xf32>
    %cst = arith.constant dense<0.000000e+00> : vector<128x256xf32>
    %2 = tpu.matmul %0, %1, %cst {dimension_numbers = #tpu.dot_dimension_numbers<[1], [0], [0], [1], [0, 0, 1, 1], [], []>} : vector<128x128xf32>, vector<128x256xf32>, vector<128x256xf32> -> vector<128x256xf32>
    %cst_3 = arith.constant 5.000000e+00 : f32
    %3 = vector.broadcast %cst_3 : f32 to vector<128x256xf32>
    %4 = arith.mulf %2, %3 : vector<128x256xf32>
    %cst_4 = arith.constant dense<0xFF800000> : vector<128xf32>
    %5 = vector.multi_reduction <maximumf>, %4, %cst_4 [1] : vector<128x256xf32> to vector<128xf32>
    %6 = vector.shape_cast %5 : vector<128xf32> to vector<128x1xf32>
    %7 = vector.broadcast %6 : vector<128x1xf32> to vector<128x256xf32>
    %8 = arith.subf %4, %7 : vector<128x256xf32>
    %9 = math.exp %8 : vector<128x256xf32>
    %c128_i32 = arith.constant 128 : i32
    %10 = arith.muli %arg0, %c128_i32 : i32
    %11 = tpu.iota {dimensions = array<i32: 0>} : vector<128x256xi32>
    %12 = vector.broadcast %10 : i32 to vector<128x256xi32>
    %13 = arith.addi %12, %11 : vector<128x256xi32>
    %14 = tpu.iota {dimensions = array<i32: 1>} : vector<128x256xi32>
    %15 = arith.cmpi ne, %13, %14 : vector<128x256xi32>
    %c256_i32 = arith.constant 256 : i32
    %16 = vector.broadcast %c256_i32 : i32 to vector<128x256xi32>
    %17 = arith.cmpi slt, %14, %16 : vector<128x256xi32>
    %18 = arith.andi %15, %17 : vector<128x256xi1>
    %c0_5 = arith.constant 0 : index
    %c0_6 = arith.constant 0 : index
    %19 = vector.load %arg3[%c0_5, %c0_6] : memref<128x1xi32, #tpu.memory_space<vmem>>, vector<128x1xi32>
    %c0_7 = arith.constant 0 : index
    %c0_8 = arith.constant 0 : index
    %20 = vector.load %arg4[%c0_7, %c0_8] : memref<1x256xi32, #tpu.memory_space<vmem>>, vector<1x256xi32>
    %21 = vector.broadcast %19 : vector<128x1xi32> to vector<128x256xi32>
    %22 = vector.broadcast %20 : vector<1x256xi32> to vector<128x256xi32>
    %23 = arith.cmpi eq, %21, %22 : vector<128x256xi32>
    %24 = arith.andi %18, %23 : vector<128x256xi1>
    %cst_9 = arith.constant 0.000000e+00 : f32
    %25 = vector.broadcast %cst_9 : f32 to vector<128x256xf32>
    %26 = arith.select %24, %9, %25 : vector<128x256xi1>, vector<128x256xf32>
    %cst_10 = arith.constant dense<0.000000e+00> : vector<128xf32>
    %27 = vector.multi_reduction <add>, %26, %cst_10 [1] : vector<128x256xf32> to vector<128xf32>
    %28 = vector.shape_cast %27 : vector<128xf32> to vector<128x1xf32>
    %cst_11 = arith.constant 0.000000e+00 : f32
    %29 = vector.broadcast %cst_11 : f32 to vector<128x256xf32>
    %30 = arith.select %18, %9, %29 : vector<128x256xi1>, vector<128x256xf32>
    %cst_12 = arith.constant dense<0.000000e+00> : vector<128xf32>
    %31 = vector.multi_reduction <add>, %30, %cst_12 [1] : vector<128x256xf32> to vector<128xf32>
    %32 = vector.shape_cast %31 : vector<128xf32> to vector<128x1xf32>
    %33 = arith.extui %24 : vector<128x256xi1> to vector<128x256xi32>
    %34 = arith.sitofp %33 : vector<128x256xi32> to vector<128x256xf32>
    %cst_13 = arith.constant dense<0.000000e+00> : vector<128xf32>
    %35 = vector.multi_reduction <add>, %34, %cst_13 [1] : vector<128x256xf32> to vector<128xf32>
    %36 = vector.shape_cast %35 : vector<128xf32> to vector<128x1xf32>
    %37 = vector.extract_strided_slice %13 {offsets = [0, 0], sizes = [128, 1], strides = [1, 1]} : vector<128x256xi32> to vector<128x1xi32>
    %c256_i32_14 = arith.constant 256 : i32
    %38 = vector.broadcast %c256_i32_14 : i32 to vector<128x1xi32>
    %39 = arith.cmpi slt, %37, %38 : vector<128x1xi32>
    %cst_15 = arith.constant 0.000000e+00 : f32
    %40 = vector.broadcast %cst_15 : f32 to vector<128x1xf32>
    %41 = arith.cmpf ogt, %36, %40 : vector<128x1xf32>
    %c0_16 = arith.constant 0 : index
    %c0_17 = arith.constant 0 : index
    %42 = vector.load %arg5[%c0_16, %c0_17] : memref<128x1xf32, #tpu.memory_space<vmem>>, vector<128x1xf32>
    %cst_18 = arith.constant 5.000000e-01 : f32
    %43 = vector.broadcast %cst_18 : f32 to vector<128x1xf32>
    %44 = arith.cmpf oge, %42, %43 : vector<128x1xf32>
    %45 = arith.andi %41, %44 : vector<128x1xi1>
    %46 = arith.andi %45, %39 : vector<128x1xi1>
    %47 = arith.divf %28, %32 : vector<128x1xf32>
    %cst_19 = arith.constant 1.000000e+00 : f32
    %48 = vector.broadcast %cst_19 : f32 to vector<128x1xf32>
    %49 = arith.select %46, %47, %48 : vector<128x1xi1>, vector<128x1xf32>
    %50 = math.log %49 : vector<128x1xf32>
    %cst_20 = arith.constant 0.000000e+00 : f32
    %51 = vector.broadcast %cst_20 : f32 to vector<128x1xf32>
    %52 = arith.subf %51, %50 : vector<128x1xf32>
    %53 = vector.shape_cast %52 : vector<128x1xf32> to vector<1x128x1xf32>
    %cst_21 = arith.constant dense<0.000000e+00> : vector<1xf32>
    %54 = vector.multi_reduction <add>, %53, %cst_21 [1, 2] : vector<1x128x1xf32> to vector<1xf32>
    %55 = vector.shape_cast %54 : vector<1xf32> to vector<1x1x1xf32>
    %56 = vector.extract %55[0, 0, 0] : f32 from vector<1x1x1xf32>
    %57 = arith.extui %46 : vector<128x1xi1> to vector<128x1xi32>
    %58 = arith.sitofp %57 : vector<128x1xi32> to vector<128x1xf32>
    %59 = vector.shape_cast %58 : vector<128x1xf32> to vector<1x128x1xf32>
    %cst_22 = arith.constant dense<0.000000e+00> : vector<1xf32>
    %60 = vector.multi_reduction <add>, %59, %cst_22 [1, 2] : vector<1x128x1xf32> to vector<1xf32>
    %61 = vector.shape_cast %60 : vector<1xf32> to vector<1x1x1xf32>
    %62 = vector.extract %61[0, 0, 0] : f32 from vector<1x1x1xf32>
    %63 = tpu.iota {dimensions = array<i32: 1>} : vector<1x8x128xi32>
    %64 = tpu.iota {dimensions = array<i32: 2>} : vector<1x8x128xi32>
    %c0_i32 = arith.constant 0 : i32
    %65 = vector.broadcast %c0_i32 : i32 to vector<1x8x128xi32>
    %66 = arith.cmpi eq, %63, %65 : vector<1x8x128xi32>
    %c0_i32_23 = arith.constant 0 : i32
    %67 = vector.broadcast %c0_i32_23 : i32 to vector<1x8x128xi32>
    %68 = arith.cmpi eq, %64, %67 : vector<1x8x128xi32>
    %69 = arith.andi %66, %68 : vector<1x8x128xi1>
    %c0_i32_24 = arith.constant 0 : i32
    %70 = vector.broadcast %c0_i32_24 : i32 to vector<1x8x128xi32>
    %71 = arith.cmpi eq, %63, %70 : vector<1x8x128xi32>
    %c1_i32 = arith.constant 1 : i32
    %72 = vector.broadcast %c1_i32 : i32 to vector<1x8x128xi32>
    %73 = arith.cmpi eq, %64, %72 : vector<1x8x128xi32>
    %74 = arith.andi %71, %73 : vector<1x8x128xi1>
    %cst_25 = arith.constant 0.000000e+00 : f32
    %75 = vector.broadcast %62 : f32 to vector<1x8x128xf32>
    %76 = vector.broadcast %cst_25 : f32 to vector<1x8x128xf32>
    %77 = arith.select %74, %75, %76 : vector<1x8x128xi1>, vector<1x8x128xf32>
    %78 = vector.broadcast %56 : f32 to vector<1x8x128xf32>
    %79 = arith.select %69, %78, %77 : vector<1x8x128xi1>, vector<1x8x128xf32>
    %c0_26 = arith.constant 0 : index
    %c0_27 = arith.constant 0 : index
    %c0_28 = arith.constant 0 : index
    %80 = vector.load %arg6[%c0_26, %c0_27, %c0_28] : memref<1x8x128xf32, #tpu.memory_space<vmem>>, vector<1x8x128xf32>
    tpu.vector_store %arg6[%c0_26, %c0_27, %c0_28], %79 {strides = array<i32>} : memref<1x8x128xf32, #tpu.memory_space<vmem>>, vector<1x8x128xf32>,
    return
  }
  func.func @transform_0(%arg0: i32) -> (i32, i32) {
    %c0_i32 = arith.constant 0 : i32
    %c0_i32_0 = arith.constant 0 : i32
    return %arg0, %c0_i32 : i32, i32
  }
  func.func @transform_1(%arg0: i32) -> (i32, i32) {
    %c0_i32 = arith.constant 0 : i32
    %c0_i32_0 = arith.constant 0 : i32
    %c0_i32_1 = arith.constant 0 : i32
    return %c0_i32, %c0_i32_0 : i32, i32
  }
  func.func @transform_2(%arg0: i32) -> (i32, i32) {
    %c0_i32 = arith.constant 0 : i32
    %c0_i32_0 = arith.constant 0 : i32
    return %arg0, %c0_i32 : i32, i32
  }
  func.func @transform_3(%arg0: i32) -> (i32, i32) {
    %c0_i32 = arith.constant 0 : i32
    %c0_i32_0 = arith.constant 0 : i32
    %c0_i32_1 = arith.constant 0 : i32
    return %c0_i32, %c0_i32_0 : i32, i32
  }
  func.func @transform_4(%arg0: i32) -> (i32, i32) {
    %c0_i32 = arith.constant 0 : i32
    %c0_i32_0 = arith.constant 0 : i32
    return %arg0, %c0_i32 : i32, i32
  }
  func.func @transform_5(%arg0: i32) -> (i32, i32, i32) {
    %c0_i32 = arith.constant 0 : i32
    %c0_i32_0 = arith.constant 0 : i32
    %c0_i32_1 = arith.constant 0 : i32
    return %arg0, %c0_i32, %c0_i32_0 : i32, i32, i32
  }
}

</mosaic_0001>

<bundles_post_ra>
// kernel: tpu_custom_call.1
= control target key start
LH: loop header
LB: loop body
LE: loop exit
PB: predicated region body
PF: predicated region fallthrough
CT: control target
= control target key end

     0   :  { %10 = vsyncpa [#allocation3], 0  ;;  %s3403_s0 = inlined_call_operand.vmem [shape: f32[256,128], index: 0, kind: input, shape index: {}]   ;;  %s3404_s1 = inlined_call_operand.vmem [shape: f32[128,256], index: 1, kind: input, shape index: {}]   ;;  %s3405_s2 = inlined_call_operand.vmem [shape: s32[256,1], index: 2, kind: input, shape index: {}]   ;;  %s3406_s3 = inlined_call_operand.vmem [shape: s32[1,256], index: 3, kind: input, shape index: {}]   ;;  %s3407_s4 = inlined_call_operand.vmem [shape: f32[256,1], index: 4, kind: input, shape index: {}]   ;;  %s3408_s5 = inlined_call_operand.hbm [shape: f32[2,8,128], index: 5, kind: output, shape index: {}]  }
   0x1   :  { %12 = vsyncpa [#allocation3 + $0x1], 0  ;;  %s1963_s18 = smov 0   ;;  %s1965_s19 = smov 0  }
   0x2   :  { %s1967_s20 = smov 0   ;;  %s1969_s21 = smov 0  }
   0x3 LB: > { %s1984_s22 = sadd.s32 4294967295, %s1928_s21   ;;  %s1579_s23 = sadd.s32 4294967294, %s1928_s21   ;;  %s1928_s21 = sphi %s1969_s21, %s3668_s21   ;;  %s1924_s20 = sphi %s1967_s20, %s3667_s20   ;;  %s1920_s19 = sphi %s1965_s19, %s3666_s19   ;;  %s1916_s18 = sphi %s1963_s18, %s3665_s18  }
   0x4   : > { %s1988_s24 = sadd.s32 1, %s1928_s21   ;;  %s145_s25 = sadd.s32 1, %s1924_s20 }
   0x5   : > { %s142_s26 = ssub.s32 %s1928_s21, %s1988_s24  ;;  %p155_p0 = scmp.ne.s32.totalorder %s1924_s20, %s1920_s19 }
   0x6   : > { %p143_p1 = scmp.eq.s32.totalorder %s142_s26, 0  ;;  %p156_p2 = scmp.eq.s32.totalorder %s1984_s22, 1 }
   0x7   : > { %p161_p3 = scmp.ne.s32.totalorder %s1920_s19, %s1916_s18  ;;  %p162_p4 = scmp.eq.s32.totalorder %s1579_s23, 1 }
   0x8   : > { %s1999_s27 = scalar_select %p143_p1, %s1924_s20, %s145_s25  }
   0x9   : > { %p2001_p5 = por %p156_p2, %p155_p0  ;;  %p2005_p6 = por %p162_p4, %p161_p3 }
   0xa   : > { %p1582_p7 = scmp.ge.s32.totalorder %s1928_s21, 1  ;;  %p213_p8 = scmp.lt.s32.totalorder %s1928_s21, 3 }
   0xc   : > { %p214_p9 = pnand %p1582_p7, %p213_p8 }
   0xe   : > { %217 = sbr.rel (%p214_p9) target bundleno = 892 (0x37c), region = 40 }
  0x15   : > { %v286_v0 = vld [vmem:[%s3404_s1 + $0x8] sm:$0xff]  ;;  %v288_v1 = vld [vmem:[%s3404_s1 + $0x18] sm:$0xff]  ;;  %v285_v2 = vld [vmem:[%s3404_s1] sm:$0xff]  ;;  %v3418_v7 = vmov 0.0   ;;  %s1584_s17 = sshll.u32 %s1984_s22, 4  ;;  %v1931_v13 = vmov 0  }
  0x16   : > { %v1643_v3 = vpack.c.bf16 %v288_v1, %v286_v0  ;;  %v287_v4 = vld [vmem:[%s3404_s1 + $0x10] sm:$0xff]  ;;  %v290_v5 = vld [vmem:[%s3404_s1 + $0x28] sm:$0xff]  ;;  %v292_v6 = vld [vmem:[%s3404_s1 + $0x38] sm:$0xff]  ;;  %381 = vmatprep.mubr.f32.mxu0 %v3418_v7  ;;  %429 = vmatprep.mubr.f32.mxu1 %v3418_v7  ;;  %p252_p10 = scmp.lt.s32.totalorder %s1584_s17, 31  ;;  %s1590_s23 = sshll.u32 %s1984_s22, 7 }
  0x17   : > { %v1645_v8 = vpack.c.bf16 %v287_v4, %v285_v2  ;;  %v1647_v9 = vpack.c.bf16 %v292_v6, %v290_v5  ;;  %v289_v10 = vld [vmem:[%s3404_s1 + $0x20] sm:$0xff]  ;;  %v291_v11 = vld [vmem:[%s3404_s1 + $0x30] sm:$0xff]  ;;  %v294_v12 = vld [vmem:[%s3404_s1 + $0x48] sm:$0xff]  ;;  %1737 = vset.pattern.permute.xlu1 %v1931_v13  ;;  %1736 = vset.pattern.permute.xlu0 %v1931_v13  ;;  %s3361_s15 = scalar_lea.hbm %s3408_s5, %s1590_s23  ;;  %s1932_s26 = smov [#allocation2]  }
  0x18   : > { %1644 = vmatprep.subr.bf16.mxu0 %v1643_v3  ;;  %1675 = vmatprep.subr.bf16.mxu1 %v1643_v3  ;;  %v296_v14 = vld [vmem:[%s3404_s1 + $0x58] sm:$0xff]  ;;  %v1649_v15 = vpack.c.bf16 %v291_v11, %v289_v10  ;;  %v293_v17 = vld [vmem:[%s3404_s1 + $0x40] sm:$0xff]  ;;  %v295_v18 = vld [vmem:[%s3404_s1 + $0x50] sm:$0xff]  ;;  %s3670_s17 = smov (!%p252_p10, %s1584_s17), 31  ;;  %s1870_s22 = sshll.u32 %s1932_s26, 4  ;;  %s1871_s22 = int_to_ptr.vmem [resolvable:$false] %s1870_s22 }
  0x19   : > { %1646 = vmatpush1.bf16.msra.mxu0 %v1645_v8  ;;  %1683 = vmatpush1.bf16.msra.mxu1 %v1645_v8  ;;  %v1651_v16 = vpack.c.bf16 %v296_v14, %v294_v12  ;;  %v298_v19 = vld [vmem:[%s3404_s1 + $0x68] sm:$0xff]  ;;  %v300_v20 = vld [vmem:[%s3404_s1 + $0x78] sm:$0xff]  ;;  %v1653_v21 = vpack.c.bf16 %v295_v18, %v293_v17  ;;  %v297_v23 = vld [vmem:[%s3404_s1 + $0x60] sm:$0xff]  ;;  %s2068_s11 = sshll.u32 %s3670_s17, 3  ;;  %s1872_s17 = scalar_lea.vmem %s1871_s22, 256 }
  0x1a   : > { %1648 = vmatprep.subr.bf16.mxu0 %v1647_v9  ;;  %1676 = vmatprep.subr.bf16.mxu1 %v1647_v9  ;;  %v1655_v22 = vpack.c.bf16 %v300_v20, %v298_v19  ;;  %v299_v24 = vld [vmem:[%s3404_s1 + $0x70] sm:$0xff]  ;;  %v302_v25 = vld [vmem:[%s3404_s1 + $0x88] sm:$0xff]  ;;  %v304_v26 = vld [vmem:[%s3404_s1 + $0x98] sm:$0xff]  ;;  %s2080_s25 = scalar_lea.vmem %s3405_s2, %s2068_s11  ;;  %s2129_s16 = scalar_lea.vmem %s3403_s0, %s2068_s11 }
  0x1b   : > { %v1657_v27 = vpack.c.bf16 %v299_v24, %v297_v23  ;;  %v1659_v28 = vpack.c.bf16 %v304_v26, %v302_v25  ;;  %v301_v29 = vld [vmem:[%s3404_s1 + $0x80] sm:$0xff]  ;;  %v303_v30 = vld [vmem:[%s3404_s1 + $0x90] sm:$0xff]  ;;  %v306_v31 = vld [vmem:[%s3404_s1 + $0xa8] sm:$0xff]  ;;  %s3070_s6 = scalar_lea.vmem %s3407_s4, %s2068_s11  ;;  %s248_s11 = sand.u32 1, %s1920_s19  }
  0x1c   : > { %v308_v32 = vld [vmem:[%s3404_s1 + $0xb8] sm:$0xff]  ;;  %v1661_v33 = vpack.c.bf16 %v303_v30, %v301_v29  ;;  %v759_v34 = vld [vmem:[%s2080_s25 + $0x8] sm:$0xff]  ;;  %v305_v36 = vld [vmem:[%s3404_s1 + $0xa0] sm:$0xff]  ;;  %s1583_s7 = sshll.u32 %s248_s11, 3 }
  0x1d   : > { %1650 = vmatpush1.bf16.msra.mxu0 %v1649_v15  ;;  %1684 = vmatpush1.bf16.msra.mxu1 %v1649_v15  ;;  %v1663_v35 = vpack.c.bf16 %v308_v32, %v306_v31  ;;  %v307_v37 = vld [vmem:[%s3404_s1 + $0xb0] sm:$0xff]  ;;  %v310_v38 = vld [vmem:[%s3404_s1 + $0xc8] sm:$0xff]  ;;  %v312_v39 = vld [vmem:[%s3404_s1 + $0xd8] sm:$0xff]  ;;  %s250_s9 = scalar_lea.vmem [#allocation2], %s1583_s7 }
  0x1e   : > { %1652 = vmatprep.subr.bf16.mxu0 %v1651_v16  ;;  %1677 = vmatprep.subr.bf16.mxu1 %v1651_v16  ;;  %v760_v40 = vld [vmem:[%s2080_s25 + $0x10] sm:$0xff]  ;;  %v758_v41 = vld [vmem:[%s2080_s25] sm:$0xff]  ;;  %v1665_v42 = vpack.c.bf16 %v307_v37, %v305_v36  ;;  %v1667_v43 = vpack.c.bf16 %v312_v39, %v310_v38  ;;  %v314_v46 = vld [vmem:[%s3404_s1 + $0xe8] sm:$0xff]  ;;  %s1496_s10 = sshll.u32 %s250_s9, 4  ;;  %s3363_s10 = int_to_ptr.vmem [resolvable:$true] %s1496_s10 }
  0x1f   : > { %779 = vperm.xlu1 %1737, %v759_v34   ;;  %v309_v44 = vld [vmem:[%s3404_s1 + $0xc0] sm:$0xff]  ;;  %v311_v45 = vld [vmem:[%s3404_s1 + $0xd0] sm:$0xff]  ;;  %v316_v47 = vld [vmem:[%s3404_s1 + $0xf8] sm:$0xff]  ;;  %776 = vperm.xlu0 %1736, %v758_v41   ;;  %p1873_p0 = scmp.lt.s32.totalorder %s3363_s10, %s1871_s22 }
  0x20   : > { %v761_v48 = vld [vmem:[%s2080_s25 + $0x18] sm:$0xff]  ;;  %v767_v49 = vld [vmem:[%s2080_s25 + $0x48] sm:$0xff]  ;;  %v1669_v50 = vpack.c.bf16 %v311_v45, %v309_v44  ;;  %v1671_v51 = vpack.c.bf16 %v316_v47, %v314_v46  ;;  %v313_v52 = vld [vmem:[%s3404_s1 + $0xe0] sm:$0xff] }
  0x21   : > { %1654 = vmatpush1.bf16.msra.mxu0 %v1653_v21  ;;  %1685 = vmatpush1.bf16.msra.mxu1 %v1653_v21  ;;  %v315_v53 = vld [vmem:[%s3404_s1 + $0xf0] sm:$0xff]  ;;  %v762_v54 = vld [vmem:[%s2080_s25 + $0x20] sm:$0xff]  ;;  %v769_v55 = vld [vmem:[%s2080_s25 + $0x58] sm:$0xff] }
  0x22   : > { %1656 = vmatprep.subr.bf16.mxu0 %v1655_v22  ;;  %1678 = vmatprep.subr.bf16.mxu1 %v1655_v22  ;;  %v1673_v56 = vpack.c.bf16 %v315_v53, %v313_v52  ;;  %v763_v57 = vld [vmem:[%s2080_s25 + $0x28] sm:$0xff]  ;;  %v269_v59 = vld [vmem:[%s2129_s16] sm:$0xff]  ;;  %v764_v61 = vld [vmem:[%s2080_s25 + $0x30] sm:$0xff] }
  0x23   : > { %782 = vperm.xlu1 %1737, %v760_v40   ;;  %803 = vperm.xlu0 %1736, %v767_v49   ;;  %v771_v58 = vld [vmem:[%s2080_s25 + $0x68] sm:$0xff]  ;;  %v277_v60 = vld [vmem:[%s2129_s16 + $0x40] sm:$0xff]  ;;  %v765_v0 = vld [vmem:[%s2080_s25 + $0x38] sm:$0xff] }
  0x24   : > { %v270_v62 = vld [vmem:[%s2129_s16 + $0x8] sm:$0xff]  ;;  %v271_v1 = vld [vmem:[%s2129_s16 + $0x10] sm:$0xff]  ;;  %v766_v3 = vld [vmem:[%s2080_s25 + $0x40] sm:$0xff] }
  0x25   : > { %1658 = vmatpush1.bf16.msra.mxu0 %v1657_v27  ;;  %1686 = vmatpush1.bf16.msra.mxu1 %v1657_v27  ;;  %v278_v63 = vld [vmem:[%s2129_s16 + $0x48] sm:$0xff]  ;;  %v279_v2 = vld [vmem:[%s2129_s16 + $0x50] sm:$0xff]  ;;  %v272_v4 = vld [vmem:[%s2129_s16 + $0x18] sm:$0xff] }
  0x26   : > { %1660 = vmatprep.subr.bf16.mxu0 %v1659_v28  ;;  %1679 = vmatprep.subr.bf16.mxu1 %v1659_v28  ;;  %v280_v5 = vld [vmem:[%s2129_s16 + $0x58] sm:$0xff]  ;;  %v768_v6 = vld [vmem:[%s2080_s25 + $0x50] sm:$0xff]  ;;  %v273_v8 = vld [vmem:[%s2129_s16 + $0x20] sm:$0xff] }
  0x27   : > { %785 = vperm.xlu1 %1737, %v761_v48   ;;  %809 = vperm.xlu0 %1736, %v769_v55   ;;  %v281_v9 = vld [vmem:[%s2129_s16 + $0x60] sm:$0xff]  ;;  %v274_v11 = vld [vmem:[%s2129_s16 + $0x28] sm:$0xff]  ;;  %v275_v13 = vld [vmem:[%s2129_s16 + $0x30] sm:$0xff] }
  0x28   : > { %v770_v10 = vld [vmem:[%s2080_s25 + $0x60] sm:$0xff]  ;;  %v282_v12 = vld [vmem:[%s2129_s16 + $0x68] sm:$0xff]  ;;  %v283_v14 = vld [vmem:[%s2129_s16 + $0x70] sm:$0xff] }
  0x29   : > { %1662 = vmatpush1.bf16.msra.mxu0 %v1661_v33  ;;  %1687 = vmatpush1.bf16.msra.mxu1 %v1661_v33  ;;  %v276_v15 = vld [vmem:[%s2129_s16 + $0x38] sm:$0xff] }
  0x2a   : > { %1664 = vmatprep.subr.bf16.mxu0 %v1663_v35  ;;  %1680 = vmatprep.subr.bf16.mxu1 %v1663_v35  ;;  %v284_v16 = vld [vmem:[%s2129_s16 + $0x78] sm:$0xff]  ;;  %s1483_s16 = scalar_lea.sflag [#allocation3], %s248_s11 }
  0x2b   : > { %788 = vperm.xlu1 %1737, %v762_v54   ;;  %815 = vperm.xlu0 %1736, %v771_v58  }
  0x2d   : > { %1666 = vmatpush1.bf16.msra.mxu0 %v1665_v42  ;;  %1688 = vmatpush1.bf16.msra.mxu1 %v1665_v42 }
  0x2e   : > { %1668 = vmatprep.subr.bf16.mxu0 %v1667_v43  ;;  %1681 = vmatprep.subr.bf16.mxu1 %v1667_v43 }
  0x2f   : > { %791 = vperm.xlu1 %1737, %v763_v57  }
  0x31   : > { %1670 = vmatpush1.bf16.msra.mxu0 %v1669_v50  ;;  %1689 = vmatpush1.bf16.msra.mxu1 %v1669_v50 }
  0x32   : > { %1672 = vmatprep.subr.bf16.mxu0 %v1671_v51  ;;  %1682 = vmatprep.subr.bf16.mxu1 %v1671_v51 }
  0x33   : > { %794 = vperm.xlu1 %1737, %v764_v61  }
  0x35   : > { %1674 = vmatpush1.bf16.msra.mxu0 %v1673_v56  ;;  %1690 = vmatpush1.bf16.msra.mxu1 %v1673_v56 }
  0x37   : > { %797 = vperm.xlu1 %1737, %v765_v0  }
  0x38   : > { %382 = vmatmul.mubr.f32.vlgmr.msra.gmra.mrb[0].mxu0 %v269_v59  ;;  %430 = vmatmul.mubr.f32.vlgmr.msra.gmra.mrb[0].mxu1 %v277_v60 }
  0x39   : > { %387 = vmatprep.mubr.f32.mxu0 %v3418_v7  ;;  %435 = vmatprep.mubr.f32.mxu1 %v3418_v7 }
  0x3b   : > { %800 = vperm.xlu1 %1737, %v766_v3  }
  0x3c   : > { %388 = vmatmul.mubr.f32.gmra.mrb[2].mxu0 %v270_v62  ;;  %436 = vmatmul.mubr.f32.gmra.mrb[2].mxu1 %v278_v63 }
  0x3d   : > { %393 = vmatprep.mubr.f32.mxu0 %v3418_v7  ;;  %441 = vmatprep.mubr.f32.mxu1 %v3418_v7 }
  0x3f   : > { %806 = vperm.xlu1 %1737, %v768_v6  }
  0x40   : > { %394 = vmatmul.mubr.f32.gmra.mrb[4].mxu0 %v271_v1  ;;  %442 = vmatmul.mubr.f32.gmra.mrb[4].mxu1 %v279_v2 }
  0x41   : > { %399 = vmatprep.mubr.f32.mxu0 %v3418_v7  ;;  %447 = vmatprep.mubr.f32.mxu1 %v3418_v7 }
  0x43   : > { %812 = vperm.xlu1 %1737, %v770_v10  }
  0x44   : > { %400 = vmatmul.mubr.f32.gmra.mrb[6].mxu0 %v272_v4  ;;  %448 = vmatmul.mubr.f32.gmra.mrb[6].mxu1 %v280_v5 }
  0x45   : > { %405 = vmatprep.mubr.f32.mxu0 %v3418_v7  ;;  %453 = vmatprep.mubr.f32.mxu1 %v3418_v7 }
  0x48   : > { %406 = vmatmul.mubr.f32.gmra.mrb[8].mxu0 %v273_v8  ;;  %454 = vmatmul.mubr.f32.gmra.mrb[8].mxu1 %v281_v9 }
  0x49   : > { %411 = vmatprep.mubr.f32.mxu0 %v3418_v7  ;;  %459 = vmatprep.mubr.f32.mxu1 %v3418_v7 }
  0x4c   : > { %412 = vmatmul.mubr.f32.gmra.mrb[10].mxu0 %v274_v11  ;;  %460 = vmatmul.mubr.f32.gmra.mrb[10].mxu1 %v282_v12 }
  0x4d   : > { %417 = vmatprep.mubr.f32.mxu0 %v3418_v7  ;;  %465 = vmatprep.mubr.f32.mxu1 %v3418_v7 }
  0x50   : > { %418 = vmatmul.mubr.f32.gmra.mrb[12].mxu0 %v275_v13  ;;  %466 = vmatmul.mubr.f32.gmra.mrb[12].mxu1 %v283_v14 }
  0x51   : > { %423 = vmatprep.mubr.f32.mxu0 %v3418_v7  ;;  %471 = vmatprep.mubr.f32.mxu1 %v3418_v7 }
  0x54   : > { %424 = vmatmul.mubr.f32.gmra.mrb[14].mxu0 %v276_v15  ;;  %472 = vmatmul.mubr.f32.gmra.mrb[14].mxu1 %v284_v16 }
 0x10b   : > { %v383_v17 = vpop.f32.mrb[0].mxu0  ;;  %v431_v18 = vpop.f32.mrb[0].mxu1 }
 0x10c   : > { %v2168_v19 = vmul.f32 5.0, %v383_v17  ;;  %v385_v20 = vpop.f32.mrb[1].mxu0  ;;  %v433_v21 = vpop.f32.mrb[1].mxu1  ;;  %v2172_v23 = vmul.f32 5.0, %v431_v18 }
 0x10d   : > { %v2170_v22 = vmul.f32 5.0, %v385_v20  ;;  %v2174_v24 = vmul.f32 5.0, %v433_v21 }
 0x10f   : > { %v437_v25 = vpop.f32.mrb[2].mxu1  ;;  %v510_v26 = vmax.f32 %v2168_v19, %v2170_v22  ;;  %v389_v27 = vpop.f32.mrb[2].mxu0  ;;  %v534_v34 = vmax.f32 %v2172_v23, %v2174_v24 }
 0x110   : > { %v2178_v28 = vmul.f32 5.0, %v437_v25  ;;  %v439_v29 = vpop.f32.mrb[3].mxu1  ;;  %v391_v30 = vpop.f32.mrb[3].mxu0  ;;  %v2182_v32 = vmul.f32 5.0, %v389_v27 }
 0x111   : > { %v2180_v31 = vmul.f32 5.0, %v439_v29  ;;  %511 = vmax.xlane.f32.xlu0 %v510_v26  ;;  %v2184_v33 = vmul.f32 5.0, %v391_v30 }
 0x113   : > { %v395_v35 = vpop.f32.mrb[4].mxu0  ;;  %v537_v36 = vmax.f32 %v2178_v28, %v2180_v31  ;;  %v443_v37 = vpop.f32.mrb[4].mxu1  ;;  %v513_v44 = vmax.f32 %v2182_v32, %v2184_v33 }
 0x114   : > { %v2190_v38 = vmul.f32 5.0, %v395_v35  ;;  %v397_v39 = vpop.f32.mrb[5].mxu0  ;;  %v445_v40 = vpop.f32.mrb[5].mxu1  ;;  %v2194_v42 = vmul.f32 5.0, %v443_v37 }
 0x115   : > { %v2192_v41 = vmul.f32 5.0, %v397_v39  ;;  %538 = vmax.xlane.f32.xlu1 %v537_v36  ;;  %535 = vmax.xlane.f32.xlu0 %v534_v34  ;;  %v2196_v43 = vmul.f32 5.0, %v445_v40 }
 0x117   : > { %v401_v45 = vpop.f32.mrb[6].mxu0  ;;  %v516_v46 = vmax.f32 %v2190_v38, %v2192_v41  ;;  %v449_v47 = vpop.f32.mrb[6].mxu1  ;;  %v540_v54 = vmax.f32 %v2194_v42, %v2196_v43 }
 0x118   : > { %v2202_v48 = vmul.f32 5.0, %v401_v45  ;;  %v403_v49 = vpop.f32.mrb[7].mxu0  ;;  %v451_v50 = vpop.f32.mrb[7].mxu1  ;;  %v2206_v52 = vmul.f32 5.0, %v449_v47 }
 0x119   : > { %v2204_v51 = vmul.f32 5.0, %v403_v49  ;;  %514 = vmax.xlane.f32.xlu0 %v513_v44  ;;  %517 = vmax.xlane.f32.xlu1 %v516_v46  ;;  %v2208_v53 = vmul.f32 5.0, %v451_v50  ;;  %v780_v46 = vpop.permute.xlu1 %779  ;;  %v772_v49 = vld [vmem:[%s2080_s25 + $0x70] sm:$0xff]  ;;  %v773_v50 = vld [vmem:[%s2080_s25 + $0x78] sm:$0xff]  ;;  %s1866_s25 = scalar_lea.vmem %s3363_s10, 128 }
 0x11a   : > { %p1867_p11 = scmp.ne.s32.totalorder %s3363_s10, %s1866_s25  ;;  %p1874_p1 = scmp.lt.s32.totalorder %s1872_s17, %s1866_s25 }
 0x11b   : > { %v407_v55 = vpop.f32.mrb[8].mxu0  ;;  %v519_v56 = vmax.f32 %v2202_v48, %v2204_v51  ;;  %v455_v57 = vpop.f32.mrb[8].mxu1  ;;  %v543_v0 = vmax.f32 %v2206_v52, %v2208_v53 }
 0x11c   : > { %v2214_v58 = vmul.f32 5.0, %v407_v55  ;;  %v409_v59 = vpop.f32.mrb[9].mxu0  ;;  %v457_v60 = vpop.f32.mrb[9].mxu1  ;;  %v2218_v62 = vmul.f32 5.0, %v455_v57  ;;  %v655_v55 = vlaneseq  ;;  %p1868_p12 = pnand %p1867_p11, %p2001_p5  ;;  %p1875_p2 = por %p1874_p1, %p1873_p0 }
 0x11d   : > { %v2216_v61 = vmul.f32 5.0, %v409_v59  ;;  %541 = vmax.xlane.f32.xlu0 %v540_v54  ;;  %520 = vmax.xlane.f32.xlu1 %v519_v56  ;;  %v2220_v63 = vmul.f32 5.0, %v457_v60  ;;  %v783_v47 = vpop.permute.xlu1 %782 }
 0x11e   : > { %v2268_v56 = vshrl.u32 %v655_v55, 7  ;;  %p1869_p13 = pneg %p1868_p12 }
 0x11f   : > { %v413_v1 = vpop.f32.mrb[10].mxu0  ;;  %v522_v2 = vmax.f32 %v2214_v58, %v2216_v61  ;;  %v461_v3 = vpop.f32.mrb[10].mxu1  ;;  %v546_v11 = vmax.f32 %v2218_v62, %v2220_v63 }
 0x120   : > { %v2226_v4 = vmul.f32 5.0, %v413_v1  ;;  %v415_v5 = vpop.f32.mrb[11].mxu0  ;;  %v463_v6 = vpop.f32.mrb[11].mxu1  ;;  %v2230_v9 = vmul.f32 5.0, %v461_v3  ;;  %v657_v59 = vadd.s32 8, %v2268_v56  ;;  %v825_v60 = vsub.s32 0, %v2268_v56  ;;  %p1876_p3 = pnand %p1875_p2, %p1869_p13 }
 0x121   : > { %v2228_v8 = vmul.f32 5.0, %v415_v5  ;;  %544 = vmax.xlane.f32.xlu1 %v543_v0  ;;  %523 = vmax.xlane.f32.xlu0 %v522_v2  ;;  %v2232_v10 = vmul.f32 5.0, %v463_v6  ;;  %v2266_v54 = vpop.permute.xlu1 %785  ;;  %v2277_v0 = vstv %s1590_s23  ;;  %v2279_v1 = vand.u32 127, %v655_v55  ;;  %v774_v2 = vld [vmem:[%s3406_s3] sm:$0x3] }
 0x122   : > { %v829_v3 = vsub.s32 1, %v2268_v56  ;;  %v2288_v6 = vadd.s32 %v2277_v0, %v657_v59  ;;  %v3482_v59 = vmov 0 }
 0x123   : > { %v419_v12 = vpop.f32.mrb[12].mxu0  ;;  %v525_v13 = vmax.f32 %v2226_v4, %v2228_v8  ;;  %v467_v14 = vpop.f32.mrb[12].mxu1  ;;  %v549_v25 = vmax.f32 %v2230_v9, %v2232_v10 }
 0x124   : > { %v2238_v15 = vmul.f32 5.0, %v419_v12  ;;  %v421_v16 = vpop.f32.mrb[13].mxu0  ;;  %v469_v17 = vpop.f32.mrb[13].mxu1  ;;  %v2242_v20 = vmul.f32 5.0, %v467_v14  ;;  %v658_v12 = vadd.s32 16, %v2268_v56  ;;  %v2296_v14 = vrot.slane %v774_v2, %v829_v3 }
 0x125   : > { %v2240_v18 = vmul.f32 5.0, %v421_v16  ;;  %547 = vmax.xlane.f32.xlu0 %v546_v11  ;;  %526 = vmax.xlane.f32.xlu1 %v525_v13  ;;  %v2244_v21 = vmul.f32 5.0, %v469_v17  ;;  %v2270_v57 = vpop.permute.xlu1 %788  ;;  %v2290_v11 = vrot.slane %v774_v2, %v825_v60  ;;  %v2294_v13 = vadd.s32 128, %v2279_v1 }
 0x126   : > { %3464 = vst [vmem:[#allocation5_spill] sm:$0xff] %v2242_v20  ;;  %3471 = vst [vmem:[#allocation12_spill] sm:$0xff] %v2296_v14  ;;  %v659_v16 = vadd.s32 24, %v2268_v56  ;;  %v2301_v17 = vadd.s32 %v2277_v0, %v2268_v56  ;;  %vm3410_vm0 = vcmp.ne.s32.totalorder %v2288_v6, %v2279_v1  ;;  %vm834_vm3 = vcmp.eq.s32.totalorder %v780_v46, %v2296_v14 }
 0x127   : > { %3465 = vst [vmem:[#allocation6_spill] sm:$0xff] %v2244_v21  ;;  %v425_v26 = vpop.f32.mrb[14].mxu0  ;;  %v528_v27 = vmax.f32 %v2238_v15, %v2240_v18  ;;  %v473_v29 = vpop.f32.mrb[14].mxu1  ;;  %v552_v40 = vmax.f32 %v2242_v20, %v2244_v21  ;;  %3470 = vst [vmem:[#allocation11_spill] sm:$0xff] %v2290_v11  ;;  %vm833_vm1 = vcmp.eq.s32.totalorder %v780_v46, %v2290_v11  ;;  %v3498_v21 = vmov 0.0  }
 0x128   : > { %v2250_v30 = vmul.f32 5.0, %v425_v26  ;;  %v427_v34 = vpop.f32.mrb[15].mxu0  ;;  %v475_v35 = vpop.f32.mrb[15].mxu1  ;;  %v2254_v37 = vmul.f32 5.0, %v473_v29  ;;  %v2308_v26 = vadd.s32 %v2277_v0, %v658_v12  ;;  %vm3409_vm2 = vcmp.ne.s32.totalorder %v2288_v6, %v2294_v13  ;;  %vm2325_vm6 = vmand %vm3410_vm0, %vm833_vm1 }
 0x129   : > { %v2252_v36 = vmul.f32 5.0, %v427_v34  ;;  %550 = vmax.xlane.f32.xlu1 %v549_v25  ;;  %529 = vmax.xlane.f32.xlu0 %v528_v27  ;;  %v2256_v39 = vmul.f32 5.0, %v475_v35  ;;  %v2285_v5 = vpop.permute.xlu1 %791  ;;  %v660_v25 = vadd.s32 32, %v2268_v56  ;;  %v661_v27 = vadd.s32 40, %v2268_v56  ;;  %v777_v34 = vpop.permute.xlu0 %776  ;;  %vm2338_vm9 = vmand %vm3409_vm2, %vm834_vm3 }
 0x12a   : > { %3466 = vst [vmem:[#allocation7_spill] sm:$0xff] %v2250_v30  ;;  %3468 = vst [vmem:[#allocation9_spill] sm:$0xff] %v2254_v37  ;;  %v2317_v35 = vadd.s32 %v2277_v0, %v659_v16  ;;  %vm3411_vm4 = vcmp.ne.s32.totalorder %v2301_v17, %v2279_v1  ;;  %vm831_vm5 = vcmp.eq.s32.totalorder %v777_v34, %v2290_v11  ;;  %v1593_v2 = vsel %vm2325_vm6, 1.0, %v3418_v7 }
 0x12b   : > { %3467 = vst [vmem:[#allocation8_spill] sm:$0xff] %v2252_v36  ;;  %3469 = vst [vmem:[#allocation10_spill] sm:$0xff] %v2256_v39  ;;  %v531_v44 = vmax.f32 %v2250_v30, %v2252_v36  ;;  %v555_v45 = vmax.f32 %v2254_v37, %v2256_v39  ;;  %vm3413_vm7 = vcmp.ne.s32.totalorder %v2301_v17, %v2294_v13  ;;  %v1594_v3 = vsel %vm2338_vm9, 1.0, %v3418_v7 }
 0x12c   : > { %vm832_vm8 = vcmp.eq.s32.totalorder %v777_v34, %v2296_v14  ;;  %vm3412_vm10 = vcmp.ne.s32.totalorder %v2308_v26, %v2279_v1  ;;  %vm835_vm11 = vcmp.eq.s32.totalorder %v783_v47, %v2290_v11  ;;  %v2346_v46 = vadd.s32 %v2277_v0, %v661_v27  ;;  %vm2356_vm14 = vmand %vm3411_vm4, %vm831_vm5 }
 0x12d   : > { %553 = vmax.xlane.f32.xlu0 %v552_v40  ;;  %532 = vmax.xlane.f32.xlu1 %v531_v44  ;;  %v2314_v29 = vpop.permute.xlu1 %794  ;;  %v3472_v40 = vmov 0  ;;  %v2330_v44 = vadd.s32 %v2277_v0, %v660_v25  ;;  %vm3417_vm12 = vcmp.ne.s32.totalorder %v2308_v26, %v2294_v13  ;;  %vm836_vm13 = vcmp.eq.s32.totalorder %v783_v47, %v2296_v14  ;;  %vm2371_vm0 = vmand %vm3413_vm7, %vm832_vm8 }
 0x12e   : > { %v3473_v40 = vsel %vm2325_vm6, 4294967295, %v3472_v40  ;;  %3477 = vst [vmem:[#allocation14_spill] sm:$0xff] %v2346_v46  ;;  %vm3415_vm15 = vcmp.ne.s32.totalorder %v2317_v35, %v2279_v1  ;;  %vm837_vm3 = vcmp.eq.s32.totalorder %v2266_v54, %v2290_v11  ;;  %vm838_vm2 = vcmp.eq.s32.totalorder %v2266_v54, %v2296_v14  ;;  %vm2378_vm5 = vmand %vm3412_vm10, %vm835_vm11 }
 0x12f   : > { %3474 = vst [vmem:[#allocation13_spill] sm:$0xff] %v2330_v44  ;;  %v3483_v59 = vsel %vm2378_vm5, 4294967295, %v3482_v59  ;;  %vm3422_vm4 = vcmp.ne.s32.totalorder %v2330_v44, %v2279_v1  ;;  %vm2395_vm8 = vmand %vm3417_vm12, %vm836_vm13  ;;  %v3484_v12 = vmov 0  ;;  %vm839_vm11 = vcmp.eq.s32.totalorder %v2270_v57, %v2290_v11 }
 0x130   : > { %v3485_v12 = vsel %vm2395_vm8, 4294967295, %v3484_v12  ;;  %v664_v25 = vadd.s32 64, %v2268_v56  ;;  %vm2410_vm7 = vmand %vm3415_vm15, %vm837_vm3  ;;  %v3487_v27 = vmov 0  ;;  %vm840_vm13 = vcmp.eq.s32.totalorder %v2270_v57, %v2296_v14 }
 0x131   : > { %556 = vmax.xlane.f32.xlu1 %v555_v45  ;;  %v3475_v45 = vmov 0  ;;  %v798_v60 = vpop.permute.xlu1 %797  ;;  %v3488_v27 = vsel %vm2410_vm7, 4294967295, %v3487_v27  ;;  %v1592_v39 = vsel %vm2371_vm0, 1.0, %v3418_v7  ;;  %vm3491_vm3 = vcmp.ne.s32.totalorder %v2317_v35, %v2294_v13  ;;  %vm2443_vm1 = vmand %vm3422_vm4, %vm839_vm11 }
 0x132   : > { %v3476_v45 = vsel %vm2338_vm9, 4294967295, %v3475_v45  ;;  %3489 = vst [vmem:[#allocation16_spill] sm:$0xff] %v3488_v27  ;;  %vm2431_vm15 = vmand %vm3491_vm3, %vm838_vm2  ;;  %v3492_v37 = vmov 0  ;;  %vm841_vm10 = vcmp.eq.s32.totalorder %v2285_v5, %v2290_v11  ;;  %v665_v57 = vadd.s32 72, %v2268_v56 }
 0x133   : > { %v3493_v37 = vsel %vm2431_vm15, 4294967295, %v3492_v37  ;;  %v3495_v54 = vmov 0  ;;  %v1595_v20 = vsel %vm2378_vm5, 1.0, %v3498_v21  ;;  %vm3499_vm3 = vcmp.ne.s32.totalorder %v2330_v44, %v2294_v13 }
 0x134   : > { %3494 = vst [vmem:[#allocation18_spill] sm:$0xff] %v3493_v37  ;;  %v3496_v54 = vsel %vm2443_vm1, 4294967295, %v3495_v54  ;;  %vm2459_vm11 = vmand %vm3499_vm3, %vm840_vm13  ;;  %v2468_v36 = vadd.s32 %v2277_v0, %v664_v25  ;;  %vm3503_vm2 = vcmp.ne.s32.totalorder %v2346_v46, %v2279_v1  ;;  %v3504_v44 = vmov 0 }
 0x135   : > { %3497 = vst [vmem:[#allocation19_spill] sm:$0xff] %v3496_v54  ;;  %vm844_vm3 = vcmp.eq.s32.totalorder %v2314_v29, %v2296_v14  ;;  %vm3507_vm5 = vcmp.eq.s32.totalorder %v2285_v5, %v2296_v14  ;;  %v3509_v25 = vmov 0  ;;  %vm845_vm13 = vcmp.eq.s32.totalorder %v798_v60, %v2290_v11  ;;  %v804_v54 = vpop.permute.xlu0 %803 }
 0x136   : > { %vm3512_vm12 = vcmp.eq.s32.totalorder %v2314_v29, %v2290_v11  ;;  %v3514_v5 = vmov 0  ;;  %v1598_v29 = vsel %vm2431_vm15, 1.0, %v3498_v21 }
 0x142   : > { %818 = vperm.xlu1 %1737, %v772_v49   ;;  %v662_v49 = vadd.s32 48, %v2268_v56 }
 0x143   : > { %821 = vperm.xlu0 %1736, %v773_v50   ;;  %v663_v50 = vadd.s32 56, %v2268_v56 }
 0x144   : > { %v2404_v16 = vadd.s32 %v2277_v0, %v662_v49  ;;  %v1591_v49 = vsel %vm2356_vm14, 1.0, %v3418_v7  ;;  %v666_v7 = vadd.s32 80, %v2268_v56 }
 0x145   : > { %v2417_v34 = vadd.s32 %v2277_v0, %v663_v50  ;;  %v1122_v50 = vadd.f32 %v1594_v3, %v1593_v2  ;;  %v1596_v2 = vsel %vm2395_vm8, 1.0, %v3498_v21  ;;  %v3500_v3 = vmov 0  ;;  %vm2473_vm8 = vmand %vm3503_vm2, %vm841_vm10 }
 0x146   : > { %3486 = vst [vmem:[#allocation15_spill] sm:$0xff] %v2404_v16  ;;  %v3501_v3 = vsel %vm2459_vm11, 4294967295, %v3500_v3  ;;  %v1119_v30 = vadd.f32 %v1592_v39, %v1591_v49  ;;  %v3505_v44 = vsel %vm2473_vm8, 4294967295, %v3504_v44  ;;  %v801_v39 = vpop.permute.xlu1 %800  ;;  %vm3508_vm10 = vcmp.ne.s32.totalorder %v2346_v46, %v2294_v13 }
 0x147   : > { %3490 = vst [vmem:[#allocation17_spill] sm:$0xff] %v2417_v34  ;;  %3502 = vst [vmem:[#allocation20_spill] sm:$0xff] %v3501_v3  ;;  %v2498_v49 = vadd.s32 %v2277_v0, %v665_v57  ;;  %vm3513_vm4 = vcmp.ne.s32.totalorder %v2404_v16, %v2279_v1  ;;  %v1599_v46 = vsel %vm2443_vm1, 1.0, %v3498_v21  ;;  %v1600_v57 = vsel %vm2459_vm11, 1.0, %v3498_v21 }
 0x148   : > { %3506 = vst [vmem:[#allocation21_spill] sm:$0xff] %v3505_v44  ;;  %vm2491_vm2 = vmand %vm3508_vm10, %vm3507_vm5  ;;  %v2533_v3 = vadd.s32 %v2277_v0, %v666_v7  ;;  %vm3521_vm9 = vcmp.ne.s32.totalorder %v2417_v34, %v2279_v1  ;;  %vm848_vm5 = vcmp.eq.s32.totalorder %v801_v39, %v2296_v14  ;;  %vm3525_vm1 = vcmp.eq.s32.totalorder %v798_v60, %v2296_v14 }
 0x149   : > { %v3510_v25 = vsel %vm2491_vm2, 4294967295, %v3509_v25  ;;  %vm2506_vm6 = vmand %vm3513_vm4, %vm3512_vm12  ;;  %vm3517_vm4 = vcmp.ne.s32.totalorder %v2404_v16, %v2294_v13  ;;  %v3522_v16 = vmov 0  ;;  %vm3526_vm15 = vcmp.ne.s32.totalorder %v2417_v34, %v2294_v13 }
 0x14a   : > { %3511 = vst [vmem:[#allocation22_spill] sm:$0xff] %v3510_v25  ;;  %v3515_v5 = vsel %vm2506_vm6, 4294967295, %v3514_v5  ;;  %vm2525_vm12 = vmand %vm3517_vm4, %vm844_vm3  ;;  %v3527_v7 = vmov 0  ;;  %vm3530_vm10 = vcmp.eq.s32.totalorder %v801_v39, %v2290_v11  ;;  %vm3531_vm11 = vcmp.ne.s32.totalorder %v2468_v36, %v2279_v1  ;;  %v807_v34 = vpop.permute.xlu1 %806 }
 0x14b   : > { %3516 = vst [vmem:[#allocation23_spill] sm:$0xff] %v3515_v5  ;;  %vm2540_vm3 = vmand %vm3521_vm9, %vm845_vm13  ;;  %v1603_v37 = vsel %vm2506_vm6, 1.0, %v3498_v21  ;;  %v1604_v27 = vsel %vm2525_vm12, 1.0, %v3498_v21  ;;  %v1602_v39 = vsel %vm2491_vm2, 1.0, %v3498_v21  ;;  %vm852_vm9 = vcmp.eq.s32.totalorder %v807_v34, %v2296_v14 }
 0x14c   : > { %v3523_v16 = vsel %vm2540_vm3, 4294967295, %v3522_v16  ;;  %vm2567_vm4 = vmand %vm3531_vm11, %vm3530_vm10  ;;  %vm851_vm10 = vcmp.eq.s32.totalorder %v807_v34, %v2290_v11  ;;  %vm3541_vm11 = vcmp.eq.s32.totalorder %v804_v54, %v2296_v14  ;;  %vm3542_vm6 = vcmp.ne.s32.totalorder %v2498_v49, %v2294_v13 }
 0x14d   : > { %3524 = vst [vmem:[#allocation25_spill] sm:$0xff] %v3523_v16  ;;  %vm2610_vm2 = vmand %vm3542_vm6, %vm3541_vm11  ;;  %vm3545_vm13 = vcmp.ne.s32.totalorder %v2533_v3, %v2279_v1  ;;  %vm3549_vm6 = vcmp.ne.s32.totalorder %v2533_v3, %v2294_v13  ;;  %vm3555_vm11 = vcmp.ne.s32.totalorder %v2468_v36, %v2279_v1 }
 0x14e   : > { %v1610_v5 = vsel %vm2610_vm2, 1.0, %v3498_v21 }
 0x162   : > { %1123 = vadd.xlane.f32.xlu0 %v1122_v50  ;;  %v1125_v50 = vadd.f32 %v1596_v2, %v1595_v20  ;;  %v1597_v20 = vsel %vm2410_vm7, 1.0, %v3498_v21  ;;  %v3518_v2 = vmov 0  ;;  %vm2554_vm7 = vmand %vm3526_vm15, %vm3525_vm1  ;;  %vm3534_vm15 = vcmp.ne.s32.totalorder %v2468_v36, %v2294_v13 }
 0x163   : > { %v3519_v2 = vsel %vm2525_vm12, 4294967295, %v3518_v2  ;;  %v3528_v7 = vsel %vm2554_vm7, 4294967295, %v3527_v7  ;;  %vm2586_vm1 = vmand %vm3534_vm15, %vm848_vm5  ;;  %vm3537_vm12 = vcmp.eq.s32.totalorder %v804_v54, %v2290_v11  ;;  %vm3538_vm5 = vcmp.ne.s32.totalorder %v2498_v49, %v2279_v1 }
 0x164   : > { %3520 = vst [vmem:[#allocation24_spill] sm:$0xff] %v3519_v2  ;;  %3529 = vst [vmem:[#allocation26_spill] sm:$0xff] %v3528_v7  ;;  %v1607_v54 = vsel %vm2567_vm4, 1.0, %v3498_v21  ;;  %v1608_v14 = vsel %vm2586_vm1, 1.0, %v3498_v21 }
 0x165   : > { %vm2601_vm15 = vmand %vm3538_vm5, %vm3537_vm12 }
 0x166   : > { %1126 = vadd.xlane.f32.xlu0 %v1125_v50  ;;  %1120 = vadd.xlane.f32.xlu1 %v1119_v30  ;;  %v1131_v30 = vadd.f32 %v1600_v57, %v1599_v46  ;;  %v1128_v50 = vadd.f32 %v1598_v29, %v1597_v20  ;;  %v1601_v46 = vsel %vm2473_vm8, 1.0, %v3498_v21  ;;  %vm2617_vm8 = vmand %vm3545_vm13, %vm851_vm10  ;;  %v1609_v2 = vsel %vm2601_vm15, 1.0, %v3498_v21 }
 0x167   : > { %v1134_v34 = vadd.f32 %v1602_v39, %v1601_v46  ;;  %vm2636_vm12 = vmand %vm3549_vm6, %vm852_vm9  ;;  %v3550_v46 = vmov 0  ;;  %v1143_v39 = vadd.f32 %v1608_v14, %v1607_v54  ;;  %v1611_v16 = vsel %vm2617_vm8, 1.0, %v3498_v21 }
 0x168   : > { %v3551_v46 = vsel %vm2636_vm12, 4294967295, %v3550_v46  ;;  %v1612_v7 = vsel %vm2636_vm12, 1.0, %v3498_v21  ;;  %vm3553_vm9 = vcmp.ne.s32.totalorder %v2301_v17, %v2279_v1  ;;  %vm3554_vm13 = vcmp.ne.s32.totalorder %v2301_v17, %v2294_v13 }
 0x169   : > { %3552 = vst [vmem:[#allocation28_spill] sm:$0xff] %v3551_v46  ;;  %v1149_v14 = vadd.f32 %v1612_v7, %v1611_v16  ;;  %vm3558_vm10 = vcmp.ne.s32.totalorder %v2288_v6, %v2294_v13  ;;  %vm3561_vm6 = vcmp.ne.s32.totalorder %v2498_v49, %v2294_v13 }
 0x16a   : > { %1132 = vadd.xlane.f32.xlu0 %v1131_v30  ;;  %1129 = vadd.xlane.f32.xlu1 %v1128_v50  ;;  %v1137_v30 = vadd.f32 %v1604_v27, %v1603_v37  ;;  %v3546_v50 = vmov 0  ;;  %v1605_v37 = vsel %vm2540_vm3, 1.0, %v3498_v21  ;;  %v1606_v27 = vsel %vm2554_vm7, 1.0, %v3498_v21 }
 0x16b   : > { %v3547_v50 = vsel %vm2617_vm8, 4294967295, %v3546_v50  ;;  %v1140_v11 = vadd.f32 %v1606_v27, %v1605_v37  ;;  %v2656_v37 = vpop.permute.xlu1 %812 }
 0x16c   : > { %3548 = vst [vmem:[#allocation27_spill] sm:$0xff] %v3547_v50 }
 0x16e   : > { %1138 = vadd.xlane.f32.xlu0 %v1137_v30  ;;  %1135 = vadd.xlane.f32.xlu1 %v1134_v34  ;;  %v1146_v30 = vadd.f32 %v1610_v5, %v1609_v2  ;;  %v2652_v34 = vpop.permute.xlu0 %809 }
 0x172   : > { %1144 = vadd.xlane.f32.xlu0 %v1143_v39  ;;  %1141 = vadd.xlane.f32.xlu1 %v1140_v11  ;;  %v2654_v54 = vpop.permute.xlu0 %815 }
 0x176   : > { %1150 = vadd.xlane.f32.xlu0 %v1149_v14  ;;  %1147 = vadd.xlane.f32.xlu1 %v1146_v30 }
 0x19e   : > { %v512_v27 = vpop.xlane.xlu0 %511 }
 0x19f   : > { %v558_v46 = vsub.f32 %v2168_v19, %v512_v27  ;;  %v559_v50 = vsub.f32 %v2170_v22, %v512_v27 }
 0x1a1   : > { %v590_v25 = vmul.f32 1.442695, %v558_v46  ;;  %v592_v44 = vmul.f32 1.442695, %v559_v50 }
 0x1a2   : > { %v539_v21 = vpop.xlane.xlu1 %538  ;;  %v536_v39 = vpop.xlane.xlu0 %535 }
 0x1a3   : > { %1738 = vpow2.f32 %v590_v25  ;;  %v574_v11 = vsub.f32 %v2172_v23, %v536_v39  ;;  %v575_v16 = vsub.f32 %v2174_v24, %v536_v39  ;;  %v576_v22 = vsub.f32 %v2178_v28, %v539_v21 }
 0x1a4   : > { %1740 = vpow2.f32 %v592_v44  ;;  %v577_v50 = vsub.f32 %v2180_v31, %v539_v21 }
 0x1a5   : > { %v622_v5 = vmul.f32 1.442695, %v574_v11  ;;  %v624_v2 = vmul.f32 1.442695, %v575_v16  ;;  %v626_v27 = vmul.f32 1.442695, %v576_v22 }
 0x1a6   : > { %v515_v7 = vpop.xlane.xlu0 %514  ;;  %v518_v14 = vpop.xlane.xlu1 %517  ;;  %v628_v11 = vmul.f32 1.442695, %v577_v50 }
 0x1a7   : > { %v560_v30 = vsub.f32 %v2182_v32, %v515_v7  ;;  %v561_v19 = vsub.f32 %v2184_v33, %v515_v7  ;;  %1742 = vpow2.f32 %v622_v5  ;;  %v562_v23 = vsub.f32 %v2190_v38, %v518_v14 }
 0x1a8   : > { %1744 = vpow2.f32 %v624_v2  ;;  %v563_v39 = vsub.f32 %v2192_v41, %v518_v14 }
 0x1a9   : > { %v594_v46 = vmul.f32 1.442695, %v560_v30  ;;  %v596_v25 = vmul.f32 1.442695, %v561_v19  ;;  %v598_v16 = vmul.f32 1.442695, %v562_v23 }
 0x1aa   : > { %v542_v44 = vpop.xlane.xlu0 %541  ;;  %v521_v24 = vpop.xlane.xlu1 %520  ;;  %v600_v5 = vmul.f32 1.442695, %v563_v39 }
 0x1ab   : > { %1746 = vpow2.f32 %v594_v46  ;;  %v578_v33 = vsub.f32 %v2194_v42, %v542_v44  ;;  %v564_v31 = vsub.f32 %v2202_v48, %v521_v24  ;;  %v565_v2 = vsub.f32 %v2204_v51, %v521_v24 }
 0x1ac   : > { %1748 = vpow2.f32 %v596_v25  ;;  %v579_v42 = vsub.f32 %v2196_v43, %v542_v44 }
 0x1ad   : > { %v1739_v32 = vpop.eup %1738  ;;  %1750 = vpow2.f32 %v626_v27  ;;  %v630_v7 = vmul.f32 1.442695, %v578_v33  ;;  %v602_v19 = vmul.f32 1.442695, %v564_v31  ;;  %v604_v25 = vmul.f32 1.442695, %v565_v2 }
 0x1ae   : > { %v1741_v28 = vpop.eup %1740  ;;  %v545_v21 = vpop.xlane.xlu1 %544  ;;  %v975_v38 = vsel %vm3553_vm9, %v1739_v32, 0.0  ;;  %1752 = vpow2.f32 %v628_v11  ;;  %v895_v50 = vsel %vm2356_vm14, %v1739_v32, 0.0  ;;  %v632_v24 = vmul.f32 1.442695, %v579_v42 }
 0x1af   : > { %v976_v41 = vsel %vm3554_vm13, %v1741_v28, 0.0  ;;  %v524_v14 = vpop.xlane.xlu0 %523  ;;  %1754 = vpow2.f32 %v598_v16  ;;  %v580_v22 = vsub.f32 %v2206_v52, %v545_v21  ;;  %v896_v51 = vsel %vm2371_vm0, %v1741_v28, 0.0 }
 0x1b0   : > { %v1007_v48 = vadd.f32 %v976_v41, %v975_v38  ;;  %1756 = vpow2.f32 %v600_v5  ;;  %v581_v23 = vsub.f32 %v2208_v53, %v545_v21  ;;  %v566_v55 = vsub.f32 %v2214_v58, %v524_v14 }
 0x1b1   : > { %v1743_v30 = vpop.eup %1742  ;;  %1758 = vpow2.f32 %v630_v7  ;;  %vm3556_vm0 = vcmp.ne.s32.totalorder %v2468_v36, %v2294_v13  ;;  %v927_v39 = vadd.f32 %v896_v51, %v895_v50  ;;  %vm3557_vm14 = vcmp.ne.s32.totalorder %v2288_v6, %v2279_v1 }
 0x1b2   : > { %v1745_v46 = vpop.eup %1744  ;;  %1008 = vadd.xlane.f32.xlu1 %v1007_v48  ;;  %v991_v43 = vsel %vm3555_vm11, %v1743_v30, 0.0  ;;  %v527_v52 = vpop.xlane.xlu1 %526  ;;  %1760 = vpow2.f32 %v602_v19  ;;  %v634_v32 = vmul.f32 1.442695, %v580_v22  ;;  %v567_v11 = vsub.f32 %v2216_v61, %v524_v14 }
 0x1b3   : > { %v992_v47 = vsel %vm3556_vm0, %v1745_v46, 0.0  ;;  %v548_v33 = vpop.xlane.xlu0 %547  ;;  %1762 = vpow2.f32 %v604_v25  ;;  %v636_v16 = vmul.f32 1.442695, %v581_v23  ;;  %v911_v31 = vsel %vm2567_vm4, %v1743_v30, 0.0 }
 0x1b4   : > { %v1031_v28 = vadd.f32 %v992_v47, %v991_v43  ;;  %1764 = vpow2.f32 %v632_v24  ;;  %v606_v5 = vmul.f32 1.442695, %v566_v55  ;;  %v582_v2 = vsub.f32 %v2218_v62, %v548_v33 }
 0x1b5   : > { %v1747_v44 = vpop.eup %1746  ;;  %v568_v61 = vsub.f32 %v2226_v4, %v527_v52  ;;  %v912_v41 = vsel %vm2586_vm1, %v1745_v46, 0.0  ;;  %1766 = vpow2.f32 %v634_v32  ;;  %v608_v60 = vmul.f32 1.442695, %v567_v11 }
 0x1b6   : > { %v1749_v27 = vpop.eup %1748  ;;  %v977_v53 = vsel %vm3557_vm14, %v1747_v44, 0.0  ;;  %928 = vadd.xlane.f32.xlu1 %v927_v39  ;;  %1032 = vadd.xlane.f32.xlu0 %v1031_v28  ;;  %v551_v7 = vpop.xlane.xlu1 %550  ;;  %v951_v14 = vadd.f32 %v912_v41, %v911_v31  ;;  %1768 = vpow2.f32 %v636_v16  ;;  %v569_v30 = vsub.f32 %v2228_v8, %v527_v52 }
 0x1b7   : > { %v978_v58 = vsel %vm3558_vm10, %v1749_v27, 0.0  ;;  %v1751_v38 = vpop.eup %1750  ;;  %vm3559_vm4 = vnez %v3473_v40  ;;  %v667_v22 = vadd.s32 88, %v2268_v56  ;;  %v583_v62 = vsub.f32 %v2220_v63, %v548_v33  ;;  %v530_v40 = vpop.xlane.xlu0 %529 }
 0x1b8   : > { %v1010_v21 = vadd.f32 %v978_v58, %v977_v53  ;;  %v1753_v42 = vpop.eup %1752  ;;  %v897_v19 = vsel %vm3559_vm4, %v1747_v44, 0.0  ;;  %vm3560_vm1 = vnez %v3476_v45  ;;  %1770 = vpow2.f32 %v606_v5 }
 0x1b9   : > { %v1755_v48 = vpop.eup %1754  ;;  %v898_v4 = vsel %vm3560_vm1, %v1749_v27, 0.0  ;;  %v638_v50 = vmul.f32 1.442695, %v582_v2  ;;  %v610_v51 = vmul.f32 1.442695, %v568_v61  ;;  %v584_v46 = vsub.f32 %v2230_v9, %v551_v7  ;;  %v3568_v2 = vld [vmem:[#allocation7_spill] sm:$0xff] }
 0x1ba   : > { %1011 = vadd.xlane.f32.xlu0 %v1010_v21  ;;  %952 = vadd.xlane.f32.xlu1 %v951_v14  ;;  %v1757_v57 = vpop.eup %1756  ;;  %v585_v8 = vsub.f32 %v2232_v10, %v551_v7  ;;  %v930_v23 = vadd.f32 %v898_v4, %v897_v19  ;;  %v993_v63 = vsel %vm3538_vm5, %v1751_v38, 0.0  ;;  %v994_v45 = vsel %vm3561_vm6, %v1753_v42, 0.0  ;;  %v3569_v7 = vld [vmem:[#allocation8_spill] sm:$0xff] }
 0x1bb   : > { %v2712_v25 = vpop.eup %1758  ;;  %1772 = vpow2.f32 %v608_v60  ;;  %v612_v43 = vmul.f32 1.442695, %v569_v30  ;;  %v1034_v44 = vadd.f32 %v994_v45, %v993_v63  ;;  %v913_v9 = vsel %vm2601_vm15, %v1751_v38, 0.0  ;;  %v554_v5 = vpop.xlane.xlu0 %553 }
 0x1bc   : > { %v2723_v24 = vpop.eup %1760  ;;  %v2726_v10 = vadd.s32 %v2277_v0, %v667_v22  ;;  %v640_v52 = vmul.f32 1.442695, %v583_v62  ;;  %v914_v27 = vsel %vm2610_vm2, %v1753_v42, 0.0  ;;  %vm3562_vm9 = vnez %v3483_v59  ;;  %v533_v59 = vpop.xlane.xlu1 %532 }
 0x1bd   : > { %v899_v55 = vsel %vm3562_vm9, %v1755_v48, 0.0  ;;  %v2732_v47 = vpop.eup %1762  ;;  %1774 = vpow2.f32 %v638_v50  ;;  %v642_v39 = vmul.f32 1.442695, %v584_v46  ;;  %v570_v20 = vsub.f32 %v2238_v15, %v530_v40  ;;  %v3572_v50 = vld [vmem:[#allocation5_spill] sm:$0xff]  ;;  %v3573_v46 = vld [vmem:[#allocation6_spill] sm:$0xff] }
 0x1be   : > { %931 = vadd.xlane.f32.xlu0 %v930_v23  ;;  %1035 = vadd.xlane.f32.xlu1 %v1034_v44  ;;  %vm3563_vm15 = vnez %v3485_v12  ;;  %v2737_v32 = vpop.eup %1764  ;;  %1776 = vpow2.f32 %v610_v51  ;;  %v644_v11 = vmul.f32 1.442695, %v585_v8  ;;  %v571_v29 = vsub.f32 %v2240_v18, %v530_v40  ;;  %v3574_v44 = vld [vmem:[#allocation16_spill] sm:$0xff] }
 0x1bf   : > { %v900_v53 = vsel %vm3563_vm15, %v1757_v57, 0.0  ;;  %v954_v33 = vadd.f32 %v914_v27, %v913_v9  ;;  %1778 = vpow2.f32 %v612_v43  ;;  %vm3564_vm2 = vcmp.ne.s32.totalorder %v2308_v26, %v2279_v1  ;;  %v2743_v58 = vpop.eup %1766 }
 0x1c0   : > { %v933_v28 = vadd.f32 %v900_v53, %v899_v55  ;;  %v979_v16 = vsel %vm3564_vm2, %v1755_v48, 0.0  ;;  %1780 = vpow2.f32 %v640_v52  ;;  %vm3565_vm13 = vcmp.ne.s32.totalorder %v2308_v26, %v2294_v13  ;;  %v2756_v31 = vpop.eup %1768  ;;  %v3576_v52 = vld [vmem:[#allocation18_spill] sm:$0xff]  ;;  %v3580_v53 = vld [vmem:[#allocation20_spill] sm:$0xff] }
 0x1c1   : > { %v980_v15 = vsel %vm3565_vm13, %v1757_v57, 0.0  ;;  %vm3566_vm11 = vcmp.ne.s32.totalorder %v2317_v35, %v2279_v1  ;;  %vm3567_vm0 = vcmp.ne.s32.totalorder %v2317_v35, %v2294_v13  ;;  %vm714_vm14 = vcmp.ne.s32.totalorder %v2726_v10, %v2279_v1 }
 0x1c2   : > { %955 = vadd.xlane.f32.xlu0 %v954_v33  ;;  %v981_v18 = vsel %vm3566_vm11, %v2723_v24, 0.0  ;;  %v982_v12 = vsel %vm3567_vm0, %v2732_v47, 0.0  ;;  %vm715_vm10 = vcmp.ne.s32.totalorder %v2726_v10, %v2294_v13  ;;  %1782 = vpow2.f32 %v642_v39  ;;  %934 = vadd.xlane.f32.xlu1 %v933_v28  ;;  %v1771_v42 = vpop.eup %1770  ;;  %v3578_v39 = vld [vmem:[#allocation19_spill] sm:$0xff] }
 0x1c3   : > { %v614_v21 = vmul.f32 1.442695, %v570_v20  ;;  %1784 = vpow2.f32 %v644_v11  ;;  %v616_v38 = vmul.f32 1.442695, %v571_v29  ;;  %v572_v61 = vsub.f32 %v3568_v2, %v533_v59  ;;  %v3585_v2 = vld [vmem:[#allocation14_spill] sm:$0xff] }
 0x1c4   : > { %v1013_v41 = vadd.f32 %v980_v15, %v979_v16  ;;  %v573_v14 = vsub.f32 %v3569_v7, %v533_v59  ;;  %v1016_v48 = vadd.f32 %v982_v12, %v981_v18  ;;  %vm3570_vm4 = vcmp.ne.s32.totalorder %v2533_v3, %v2279_v1  ;;  %v3582_v12 = vld [vmem:[#allocation13_spill] sm:$0xff] }
 0x1c5   : > { %v995_v60 = vsel %vm3570_vm4, %v2712_v25, 0.0  ;;  %vm3571_vm1 = vcmp.ne.s32.totalorder %v2533_v3, %v2294_v13  ;;  %v997_v19 = vsel %vm714_vm14, %v2743_v58, 0.0  ;;  %v998_v22 = vsel %vm715_vm10, %v2756_v31, 0.0  ;;  %v1773_v62 = vpop.eup %1772 }
 0x1c6   : > { %v996_v30 = vsel %vm3571_vm1, %v2737_v32, 0.0  ;;  %1014 = vadd.xlane.f32.xlu0 %v1013_v41  ;;  %v668_v4 = vadd.s32 96, %v2268_v56  ;;  %v669_v57 = vadd.s32 104, %v2268_v56  ;;  %1786 = vpow2.f32 %v614_v21  ;;  %1017 = vadd.xlane.f32.xlu1 %v1016_v48 }
 0x1c7   : > { %v586_v51 = vsub.f32 %v3572_v50, %v554_v5  ;;  %1788 = vpow2.f32 %v616_v38  ;;  %v587_v8 = vsub.f32 %v3573_v46, %v554_v5  ;;  %v618_v40 = vmul.f32 1.442695, %v572_v61  ;;  %v2784_v63 = vpop.eup %1774  ;;  %v3589_v46 = vld [vmem:[#allocation10_spill] sm:$0xff] }
 0x1c8   : > { %v1037_v23 = vadd.f32 %v996_v30, %v995_v60  ;;  %v620_v45 = vmul.f32 1.442695, %v573_v14  ;;  %v1040_v43 = vadd.f32 %v998_v22, %v997_v19  ;;  %vm3575_vm5 = vnez %v3574_v44  ;;  %v1777_v55 = vpop.eup %1776  ;;  %v557_v14 = vpop.xlane.xlu1 %556 }
 0x1c9   : > { %v901_v9 = vsel %vm3575_vm5, %v2723_v24, 0.0  ;;  %vm3577_vm6 = vnez %v3576_v52  ;;  %vm3579_vm9 = vnez %v3578_v39  ;;  %vm3581_vm15 = vnez %v3580_v53  ;;  %v1779_v29 = vpop.eup %1778  ;;  %v3594_v52 = vld [vmem:[#allocation23_spill] sm:$0xff]  ;;  %v3596_v39 = vld [vmem:[#allocation24_spill] sm:$0xff] }
 0x1ca   : > { %v902_v27 = vsel %vm3577_vm6, %v2732_v47, 0.0  ;;  %1038 = vadd.xlane.f32.xlu0 %v1037_v23  ;;  %v903_v20 = vsel %vm3579_vm9, %v1771_v42, 0.0  ;;  %v904_v11 = vsel %vm3581_vm15, %v1773_v62, 0.0  ;;  %v2797_v33 = vadd.s32 %v2277_v0, %v668_v4  ;;  %1041 = vadd.xlane.f32.xlu1 %v1040_v43  ;;  %v2799_v28 = vpop.eup %1780  ;;  %v3588_v4 = vld [vmem:[#allocation9_spill] sm:$0xff]  ;;  %v3592_v43 = vld [vmem:[#allocation22_spill] sm:$0xff] }
 0x1cb   : > { %v646_v59 = vmul.f32 1.442695, %v586_v51  ;;  %v2802_v24 = vadd.s32 %v2277_v0, %v669_v57  ;;  %v648_v47 = vmul.f32 1.442695, %v587_v8  ;;  %1790 = vpow2.f32 %v618_v40  ;;  %v3590_v23 = vld [vmem:[#allocation21_spill] sm:$0xff] }
 0x1cc   : > { %v936_v16 = vadd.f32 %v902_v27, %v901_v9  ;;  %v2804_v15 = vpop.eup %1782  ;;  %1792 = vpow2.f32 %v620_v45  ;;  %v939_v18 = vadd.f32 %v904_v11, %v903_v20  ;;  %vm3583_vm2 = vcmp.ne.s32.totalorder %v3582_v12, %v2279_v1 }
 0x1cd   : > { %v983_v21 = vsel %vm3583_vm2, %v1771_v42, 0.0  ;;  %vm3584_vm13 = vcmp.ne.s32.totalorder %v3582_v12, %v2294_v13  ;;  %v2812_v5 = vpop.eup %1784  ;;  %vm3586_vm11 = vcmp.ne.s32.totalorder %v3585_v2, %v2279_v1  ;;  %vm3587_vm0 = vcmp.ne.s32.totalorder %v3585_v2, %v2294_v13 }
 0x1ce   : > { %v984_v38 = vsel %vm3584_vm13, %v1773_v62, 0.0  ;;  %937 = vadd.xlane.f32.xlu0 %v936_v16  ;;  %v985_v61 = vsel %vm3586_vm11, %v1777_v55, 0.0  ;;  %v986_v41 = vsel %vm3587_vm0, %v1779_v29, 0.0  ;;  %vm716_vm4 = vcmp.ne.s32.totalorder %v2797_v33, %v2279_v1  ;;  %940 = vadd.xlane.f32.xlu1 %v939_v18  ;;  %v3598_v18 = vld [vmem:[#allocation15_spill] sm:$0xff] }
 0x1cf   : > { %1794 = vpow2.f32 %v646_v59  ;;  %vm717_vm1 = vcmp.ne.s32.totalorder %v2797_v33, %v2294_v13  ;;  %vm718_vm5 = vcmp.ne.s32.totalorder %v2802_v24, %v2279_v1  ;;  %v1019_v42 = vadd.f32 %v984_v38, %v983_v21 }
 0x1d0   : > { %1796 = vpow2.f32 %v648_v47  ;;  %v1787_v7 = vpop.eup %1786  ;;  %vm719_vm6 = vcmp.ne.s32.totalorder %v2802_v24, %v2294_v13  ;;  %v1022_v48 = vadd.f32 %v986_v41, %v985_v61  ;;  %v999_v60 = vsel %vm716_vm4, %v2784_v63, 0.0  ;;  %v3601_v41 = vld [vmem:[#allocation11_spill] sm:$0xff] }
 0x1d1   : > { %v1000_v30 = vsel %vm717_vm1, %v2799_v28, 0.0  ;;  %v1789_v19 = vpop.eup %1788  ;;  %v1001_v22 = vsel %vm718_vm5, %v2804_v15, 0.0  ;;  %v1002_v62 = vsel %vm719_vm6, %v2812_v5, 0.0  ;;  %v588_v57 = vsub.f32 %v3588_v4, %v557_v14 }
 0x1d2   : > { %1020 = vadd.xlane.f32.xlu0 %v1019_v42  ;;  %1023 = vadd.xlane.f32.xlu1 %v1022_v48  ;;  %v670_v50 = vadd.s32 112, %v2268_v56  ;;  %v1043_v51 = vadd.f32 %v1000_v30, %v999_v60  ;;  %v589_v8 = vsub.f32 %v3589_v46, %v557_v14  ;;  %v1046_v40 = vadd.f32 %v1002_v62, %v1001_v22  ;;  %v3602_v42 = vld [vmem:[#allocation17_spill] sm:$0xff] }
 0x1d3   : > { %vm3591_vm9 = vnez %v3590_v23  ;;  %vm3593_vm15 = vnez %v3592_v43  ;;  %vm3595_vm2 = vnez %v3594_v52  ;;  %vm3597_vm13 = vnez %v3596_v39 }
 0x1d4   : > { %v905_v45 = vsel %vm3591_vm9, %v1777_v55, 0.0  ;;  %v906_v44 = vsel %vm3593_vm15, %v1779_v29, 0.0  ;;  %v907_v27 = vsel %vm3595_vm2, %v1787_v7, 0.0  ;;  %v908_v20 = vsel %vm3597_vm13, %v1789_v19, 0.0 }
 0x1d5   : > { %v2851_v9 = vpop.eup %1790  ;;  %v650_v11 = vmul.f32 1.442695, %v588_v57  ;;  %v2858_v59 = vadd.s32 %v2277_v0, %v670_v50  ;;  %v942_v47 = vadd.f32 %v906_v44, %v905_v45  ;;  %v652_v16 = vmul.f32 1.442695, %v589_v8 }
 0x1d6   : > { %1044 = vadd.xlane.f32.xlu0 %v1043_v51  ;;  %v1793_v53 = vpop.eup %1792  ;;  %1047 = vadd.xlane.f32.xlu1 %v1046_v40  ;;  %v945_v29 = vadd.f32 %v908_v20, %v907_v27  ;;  %vm3599_vm11 = vcmp.ne.s32.totalorder %v3598_v18, %v2279_v1  ;;  %vm3600_vm0 = vcmp.ne.s32.totalorder %v3598_v18, %v2294_v13  ;;  %v915_v57 = vsel %vm2617_vm8, %v2712_v25, 0.0 }
 0x1d7   : > { %v987_v21 = vsel %vm3599_vm11, %v1787_v7, 0.0  ;;  %v988_v38 = vsel %vm3600_vm0, %v1789_v19, 0.0  ;;  %vm853_vm9 = vcmp.eq.s32.totalorder %v2652_v34, %v3601_v41  ;;  %vm3603_vm15 = vcmp.ne.s32.totalorder %v3602_v42, %v2279_v1  ;;  %v3605_v7 = vld [vmem:[#allocation12_spill] sm:$0xff] }
 0x1d8   : > { %v989_v14 = vsel %vm3603_vm15, %v2851_v9, 0.0  ;;  %vm3604_vm2 = vcmp.ne.s32.totalorder %v3602_v42, %v2294_v13  ;;  %vm854_vm13 = vcmp.eq.s32.totalorder %v2652_v34, %v3605_v7  ;;  %1798 = vpow2.f32 %v650_v11  ;;  %vm2888_vm15 = vmand %vm714_vm14, %vm853_vm9 }
 0x1d9   : > { %v2860_v55 = vpop.eup %1794  ;;  %v990_v48 = vsel %vm3604_vm2, %v1793_v53, 0.0  ;;  %vm720_vm11 = vcmp.ne.s32.totalorder %v2858_v59, %v2279_v1  ;;  %vm721_vm0 = vcmp.ne.s32.totalorder %v2858_v59, %v2294_v13  ;;  %v1025_v60 = vadd.f32 %v988_v38, %v987_v21  ;;  %vm2903_vm2 = vmand %vm715_vm10, %vm854_vm13 }
 0x1da   : > { %v2868_v61 = vpop.eup %1796  ;;  %943 = vadd.xlane.f32.xlu0 %v942_v47  ;;  %946 = vadd.xlane.f32.xlu1 %v945_v29  ;;  %1800 = vpow2.f32 %v652_v16  ;;  %v1028_v19 = vadd.f32 %v990_v48, %v989_v14  ;;  %v1003_v34 = vsel %vm720_vm11, %v2860_v55, 0.0  ;;  %v916_v51 = vsel %vm2636_vm12, %v2737_v32, 0.0 }
 0x1db   : > { %v1004_v22 = vsel %vm721_vm0, %v2868_v61, 0.0  ;;  %vm855_vm14 = vcmp.eq.s32.totalorder %v2656_v37, %v3601_v41  ;;  %v671_v8 = vadd.s32 120, %v2268_v56  ;;  %v957_v40 = vadd.f32 %v916_v51, %v915_v57 }
 0x1dc   : > { %v1049_v46 = vadd.f32 %v1004_v22, %v1003_v34  ;;  %v3612_v23 = vmov 0.0   ;;  %vm856_vm8 = vcmp.eq.s32.totalorder %v2656_v37, %v3605_v7  ;;  %v917_v32 = vsel %vm2888_vm15, %v2743_v58, 0.0  ;;  %vm2933_vm12 = vmand %vm716_vm4, %vm855_vm14 }
 0x1dd   : > { %v1613_v45 = vsel %vm2888_vm15, 1.0, %v3612_v23  ;;  %v1614_v25 = vsel %vm2903_vm2, 1.0, %v3612_v23  ;;  %v918_v43 = vsel %vm2903_vm2, %v2756_v31, 0.0  ;;  %vm2940_vm10 = vmand %vm717_vm1, %vm856_vm8  ;;  %v2945_v58 = vadd.s32 %v2277_v0, %v671_v8 }
 0x1de   : > { %1026 = vadd.xlane.f32.xlu0 %v1025_v60  ;;  %1029 = vadd.xlane.f32.xlu1 %v1028_v19  ;;  %v1152_v52 = vadd.f32 %v1614_v25, %v1613_v45  ;;  %v960_v31 = vadd.f32 %v918_v43, %v917_v32  ;;  %v909_v39 = vsel %vm2540_vm3, %v2851_v9, 0.0  ;;  %v910_v11 = vsel %vm2554_vm7, %v1793_v53, 0.0  ;;  %v819_v9 = vpop.permute.xlu1 %818  ;;  %v822_v60 = vpop.permute.xlu0 %821 }
 0x1df   : > { %vm857_vm4 = vcmp.eq.s32.totalorder %v2654_v54, %v3601_v41  ;;  %v919_v16 = vsel %vm2933_vm12, %v2784_v63, 0.0  ;;  %v920_v0 = vsel %vm2940_vm10, %v2799_v28, 0.0  ;;  %vm858_vm3 = vcmp.eq.s32.totalorder %v2654_v54, %v3605_v7 }
 0x1e0   : > { %v948_v53 = vadd.f32 %v910_v11, %v909_v39  ;;  %v1615_v21 = vsel %vm2933_vm12, 1.0, %v3612_v23  ;;  %vm2968_vm7 = vmand %vm718_vm5, %vm857_vm4  ;;  %vm722_vm1 = vcmp.ne.s32.totalorder %v2945_v58, %v2279_v1  ;;  %vm723_vm9 = vcmp.ne.s32.totalorder %v2945_v58, %v2294_v13 }
 0x1e1   : > { %v963_v54 = vadd.f32 %v920_v0, %v919_v16  ;;  %v1616_v28 = vsel %vm2940_vm10, 1.0, %v3612_v23  ;;  %vm2982_vm13 = vmand %vm719_vm6, %vm858_vm3  ;;  %vm859_vm5 = vcmp.eq.s32.totalorder %v819_v9, %v3601_v41  ;;  %vm860_vm15 = vcmp.eq.s32.totalorder %v819_v9, %v3605_v7 }
 0x1e2   : > { %1050 = vadd.xlane.f32.xlu0 %v1049_v46  ;;  %958 = vadd.xlane.f32.xlu1 %v957_v40  ;;  %v1799_v47 = vpop.eup %1798  ;;  %v1155_v30 = vadd.f32 %v1616_v28, %v1615_v21  ;;  %vm2997_vm6 = vmand %vm720_vm11, %vm859_vm5  ;;  %v1617_v22 = vsel %vm2968_vm7, 1.0, %v3612_v23  ;;  %v1618_v62 = vsel %vm2982_vm13, 1.0, %v3612_v23  ;;  %vm861_vm2 = vcmp.eq.s32.totalorder %v822_v60, %v3601_v41  ;;  %v1200_v28 = vld [vmem:[%s3070_s6 + $0x8] sm:$0xff] }
 0x1e3   : > { %v1005_v14 = vsel %vm722_vm1, %v1799_v47, 0.0  ;;  %vm3011_vm14 = vmand %vm721_vm0, %vm860_vm15  ;;  %v921_v57 = vsel %vm2968_vm7, %v2804_v15, 0.0  ;;  %v922_v50 = vsel %vm2982_vm13, %v2812_v5, 0.0  ;;  %vm862_vm11 = vcmp.eq.s32.totalorder %v822_v60, %v3605_v7 }
 0x1e4   : > { %v1801_v29 = vpop.eup %1800  ;;  %v1158_v41 = vadd.f32 %v1618_v62, %v1617_v22  ;;  %vm3025_vm0 = vmand %vm722_vm1, %vm861_vm2  ;;  %v966_v46 = vadd.f32 %v922_v50, %v921_v57  ;;  %v1619_v15 = vsel %vm2997_vm6, 1.0, %v3612_v23  ;;  %v1620_v5 = vsel %vm3011_vm14, 1.0, %v3612_v23  ;;  %v1203_v57 = vld [vmem:[%s3070_s6 + $0x20] sm:$0xff]  ;;  %v1209_v50 = vld [vmem:[%s3070_s6 + $0x50] sm:$0xff] }
 0x1e5   : > { %v1006_v48 = vsel %vm723_vm9, %v1801_v29, 0.0  ;;  %vm894_vm8 = vmand %vm723_vm9, %vm862_vm11  ;;  %v923_v7 = vsel %vm2997_vm6, %v2860_v55, 0.0  ;;  %v924_v8 = vsel %vm3011_vm14, %v2868_v61, 0.0  ;;  %v1161_v40 = vadd.f32 %v1620_v5, %v1619_v15  ;;  %v1207_v22 = vld [vmem:[%s3070_s6 + $0x40] sm:$0xff] }
 0x1e6   : > { %1153 = vadd.xlane.f32.xlu0 %v1152_v52  ;;  %961 = vadd.xlane.f32.xlu1 %v960_v31  ;;  %v1052_v34 = vadd.f32 %v1006_v48, %v1005_v14  ;;  %v969_v45 = vadd.f32 %v924_v8, %v923_v7  ;;  %v1621_v25 = vsel %vm3025_vm0, 1.0, %v3612_v23  ;;  %v1622_v32 = vsel %vm894_vm8, 1.0, %v3612_v23  ;;  %v1201_v48 = vld [vmem:[%s3070_s6 + $0x10] sm:$0xff] }
 0x1e7   : > { %v925_v13 = vsel %vm3025_vm0, %v1799_v47, 0.0  ;;  %v926_v43 = vsel %vm894_vm8, %v1801_v29, 0.0  ;;  %v1164_v55 = vadd.f32 %v1622_v32, %v1621_v25  ;;  %vm1216_vm4 = vcmp.ge.f32.partialorder %v1200_v28, 0.5 }
 0x1e8   : > { %v972_v44 = vadd.f32 %v926_v43, %v925_v13  ;;  %vm1167_vm7 = vcmp.lt.s32.totalorder %v2301_v17, 256  ;;  %vm1168_vm9 = vcmp.lt.s32.totalorder %v2288_v6, 256  ;;  %vm1217_vm5 = vcmp.ge.f32.partialorder %v1201_v48, 0.5 }
 0x1e9   : > { %vm1169_vm0 = vcmp.lt.s32.totalorder %v2308_v26, 256 }
 0x1ea   : > { %949 = vadd.xlane.f32.xlu0 %v948_v53  ;;  %964 = vadd.xlane.f32.xlu1 %v963_v54  ;;  %v1199_v54 = vld [vmem:[%s3070_s6] sm:$0xff] }
 0x1eb   : > { %vm1215_vm12 = vcmp.ge.f32.partialorder %v1199_v54, 0.5 }
 0x1ee   : > { %1156 = vadd.xlane.f32.xlu0 %v1155_v30  ;;  %1053 = vadd.xlane.f32.xlu1 %v1052_v34  ;;  %v1202_v30 = vld [vmem:[%s3070_s6 + $0x18] sm:$0xff] }
 0x1ef   : > { %v1124_v61 = vpop.xlane.xlu0 %1123  ;;  %vm1218_vm14 = vcmp.ge.f32.partialorder %v1202_v30, 0.5 }
 0x1f0   : > { %vm1184_vm3 = vcmp.gt.f32.partialorder %v1124_v61, 0.0 }
 0x1f1   : > { %vm1232_vm13 = vmand %vm1184_vm3, %vm1216_vm4 }
 0x1f2   : > { %1159 = vadd.xlane.f32.xlu0 %v1158_v41  ;;  %967 = vadd.xlane.f32.xlu1 %v966_v46  ;;  %vm3088_vm2 = vmand %vm1232_vm13, %vm1168_vm9  ;;  %v1204_v46 = vld [vmem:[%s3070_s6 + $0x28] sm:$0xff] }
 0x1f3   : > { %v1121_v52 = vpop.xlane.xlu1 %1120  ;;  %v1127_v37 = vpop.xlane.xlu0 %1126  ;;  %v1624_v4 = vsel %vm3088_vm2, 1.0, %v3612_v23  ;;  %vm1220_vm13 = vcmp.ge.f32.partialorder %v1204_v46, 0.5 }
 0x1f4   : > { %vm1183_vm10 = vcmp.gt.f32.partialorder %v1121_v52, 0.0  ;;  %vm1185_vm15 = vcmp.gt.f32.partialorder %v1127_v37, 0.0  ;;  %v1205_v52 = vld [vmem:[%s3070_s6 + $0x30] sm:$0xff] }
 0x1f5   : > { %vm1231_vm1 = vmand %vm1183_vm10, %vm1215_vm12  ;;  %vm1359_vm12 = vcmask 7168   ;;  %vm1170_vm10 = vcmp.lt.s32.totalorder %v2317_v35, 256 }
 0x1f6   : > { %1162 = vadd.xlane.f32.xlu0 %v1161_v40  ;;  %970 = vadd.xlane.f32.xlu1 %v969_v45  ;;  %vm3084_vm6 = vmand %vm1231_vm1, %vm1167_vm7  ;;  %v1433_v7 = vsel %vm1359_vm12, %v1624_v4, 0.0  ;;  %vm1219_vm7 = vcmp.ge.f32.partialorder %v1203_v57, 0.5 }
 0x1f7   : > { %v1130_v31 = vpop.xlane.xlu1 %1129  ;;  %v3050_v27 = vpop.xlane.xlu0 %1132  ;;  %vm1233_vm8 = vmand %vm1185_vm15, %vm1217_vm5  ;;  %v1623_v6 = vsel %vm3084_vm6, 1.0, %v3612_v23  ;;  %vm1171_vm15 = vcmp.lt.s32.totalorder %v3582_v12, 256 }
 0x1f8   : > { %vm1186_vm11 = vcmp.gt.f32.partialorder %v1130_v31, 0.0  ;;  %vm3101_vm3 = vmand %vm1233_vm8, %vm1169_vm0  ;;  %v1432_v26 = vsel %vm1359_vm12, %v1623_v6, 0.0  ;;  %vm1187_vm1 = vcmp.gt.f32.partialorder %v3050_v27, 0.0  ;;  %v1212_v6 = vld [vmem:[%s3070_s6 + $0x68] sm:$0xff] }
 0x1f9   : > { %vm1234_vm4 = vmand %vm1186_vm11, %vm1218_vm14  ;;  %v1625_v8 = vsel %vm3101_vm3, 1.0, %v3612_v23  ;;  %v1434_v40 = vadd.f32 %v1433_v7, %v1432_v26  ;;  %vm1172_vm11 = vcmp.lt.s32.totalorder %v3585_v2, 256 }
 0x1fa   : > { %1165 = vadd.xlane.f32.xlu0 %v1164_v55  ;;  %973 = vadd.xlane.f32.xlu1 %v972_v44  ;;  %vm3113_vm9 = vmand %vm1234_vm4, %vm1170_vm10  ;;  %v1435_v55 = vsel %vm1359_vm12, %v1625_v8, 0.0  ;;  %vm1221_vm10 = vcmp.ge.f32.partialorder %v1205_v52, 0.5 }
 0x1fb   : > { %v3052_v39 = vpop.xlane.xlu1 %1135  ;;  %v3054_v20 = vpop.xlane.xlu0 %1138  ;;  %vm1235_vm14 = vmand %vm1187_vm1, %vm1219_vm7  ;;  %v1626_v32 = vsel %vm3113_vm9, 1.0, %v3612_v23  ;;  %v1436_v61 = vadd.f32 %v1435_v55, %v1434_v40  ;;  %vm1173_vm1 = vcmp.lt.s32.totalorder %v3598_v18, 256 }
 0x1fc   : > { %vm1188_vm5 = vcmp.gt.f32.partialorder %v3052_v39, 0.0  ;;  %vm3135_vm8 = vmand %vm1235_vm14, %vm1171_vm15  ;;  %v1437_v31 = vsel %vm1359_vm12, %v1626_v32, 0.0  ;;  %vm1189_vm4 = vcmp.gt.f32.partialorder %v3054_v20, 0.0  ;;  %vm1223_vm14 = vcmp.ge.f32.partialorder %v1207_v22, 0.5 }
 0x1fd   : > { %vm3130_vm0 = vmand %vm1188_vm5, %vm1220_vm13  ;;  %v1438_v48 = vadd.f32 %v1437_v31, %v1436_v61 }
 0x1fe   : > { %vm3151_vm7 = vmand %vm3130_vm0, %vm1172_vm11  ;;  %vm1175_vm0 = vcmp.lt.s32.totalorder %v2468_v36, 256 }
 0x1ff   : > { %v3056_v11 = vpop.xlane.xlu1 %1141  ;;  %v3058_v47 = vpop.xlane.xlu0 %1144  ;;  %vm1237_vm13 = vmand %vm1189_vm4, %vm1221_vm10  ;;  %v1628_v30 = vsel %vm3151_vm7, 1.0, %v3612_v23 }
 0x200   : > { %vm3173_vm15 = vmand %vm1237_vm13, %vm1173_vm1  ;;  %v1441_v18 = vsel %vm1359_vm12, %v1628_v30, 0.0  ;;  %vm1191_vm11 = vcmp.gt.f32.partialorder %v3058_v47, 0.0  ;;  %vm1176_vm13 = vcmp.lt.s32.totalorder %v2498_v49, 256 }
 0x203   : > { %v3060_v16 = vpop.xlane.xlu1 %1147  ;;  %v3062_v29 = vpop.xlane.xlu0 %1150 }
 0x204   : > { %vm1193_vm1 = vcmp.gt.f32.partialorder %v3062_v29, 0.0 }
 0x23f   : > { %v1009_v0 = vpop.xlane.xlu1 %1008 }
 0x243   : > { %v929_v9 = vpop.xlane.xlu1 %928  ;;  %v3064_v53 = vpop.xlane.xlu0 %1032 }
 0x247   : > { %v1012_v21 = vpop.xlane.xlu0 %1011  ;;  %v3072_v63 = vpop.xlane.xlu1 %952 }
 0x248   : > { %1802 = vrcp.f32 %v1012_v21  ;;  %v1206_v21 = vld [vmem:[%s3070_s6 + $0x38] sm:$0xff] }
 0x249   : > { %1804 = vrcp.f32 %v1009_v0 }
 0x24b   : > { %v932_v38 = vpop.xlane.xlu0 %931  ;;  %v3076_v14 = vpop.xlane.xlu1 %1035 }
 0x24f   : > { %v3080_v60 = vpop.xlane.xlu0 %955  ;;  %v935_v19 = vpop.xlane.xlu1 %934 }
 0x252   : > { %v1803_v51 = vpop.eup %1802 }
 0x253   : > { %v1015_v17 = vpop.xlane.xlu0 %1014  ;;  %v1018_v62 = vpop.xlane.xlu1 %1017  ;;  %v1266_v45 = vmul.f32 %v1803_v51, %v932_v38 }
 0x254   : > { %1806 = vrcp.f32 %v1015_v17  ;;  %v1805_v5 = vpop.eup %1804 }
 0x255   : > { %1808 = vrcp.f32 %v1018_v62  ;;  %v1264_v13 = vmul.f32 %v1805_v5, %v929_v9  ;;  %v1296_v27 = vsel %vm3088_vm2, %v1266_v45, 1.0  ;;  %vm1190_vm2 = vcmp.gt.f32.partialorder %v3056_v11, 0.0  ;;  %v1208_v11 = vld [vmem:[%s3070_s6 + $0x48] sm:$0xff] }
 0x256   : > { %1810 = vrcp.f32 %v3064_v53  ;;  %vm1224_vm4 = vcmp.ge.f32.partialorder %v1208_v11, 0.5  ;;  %v1629_v5 = vsel %vm3173_vm15, 1.0, %v3612_v23 }
 0x257   : > { %v3106_v41 = vpop.xlane.xlu0 %1038  ;;  %v3109_v15 = vpop.xlane.xlu1 %1041  ;;  %1812 = vrcp.f32 %v3076_v14  ;;  %v1295_v54 = vsel %vm3084_vm6, %v1264_v13, 1.0  ;;  %v1627_v14 = vsel %vm3135_vm8, 1.0, %v3612_v23  ;;  %vm1222_vm6 = vcmp.ge.f32.partialorder %v1206_v21, 0.5 }
 0x258   : > { %v1439_v34 = vsel %vm1359_vm12, %v1627_v14, 0.0  ;;  %vm1238_vm5 = vmand %vm1190_vm2, %vm1222_vm6  ;;  %vm1225_vm2 = vcmp.ge.f32.partialorder %v1209_v50, 0.5 }
 0x259   : > { %v1440_v17 = vadd.f32 %v1439_v34, %v1438_v48  ;;  %vm3195_vm6 = vmand %vm1191_vm11, %vm1223_vm14  ;;  %vm1177_vm14 = vcmp.lt.s32.totalorder %v2533_v3, 256 }
 0x25b   : > { %v938_v25 = vpop.xlane.xlu0 %937  ;;  %v3125_v43 = vpop.xlane.xlu1 %940  ;;  %v1442_v7 = vadd.f32 %v1441_v18, %v1440_v17 }
 0x25e   : > { %v1807_v44 = vpop.eup %1806 }
 0x25f   : > { %v1268_v39 = vmul.f32 %v1807_v44, %v935_v19  ;;  %v1021_v0 = vpop.xlane.xlu0 %1020  ;;  %v1809_v9 = vpop.eup %1808  ;;  %v1443_v44 = vsel %vm1359_vm12, %v1629_v5, 0.0 }
 0x260   : > { %1814 = vrcp.f32 %v1021_v0  ;;  %v1024_v53 = vpop.xlane.xlu1 %1023  ;;  %v1270_v2 = vmul.f32 %v1809_v9, %v938_v25  ;;  %v1811_v57 = vpop.eup %1810  ;;  %v1444_v52 = vadd.f32 %v1443_v44, %v1442_v7 }
 0x261   : > { %v1297_v38 = vsel %vm3101_vm3, %v1268_v39, 1.0  ;;  %1816 = vrcp.f32 %v1024_v53  ;;  %vm1174_vm3 = vcmp.lt.s32.totalorder %v3602_v42, 256  ;;  %v1813_v42 = vpop.eup %1812  ;;  %v1280_v25 = vmul.f32 %v1811_v57, %v3072_v63  ;;  %v1210_v39 = vld [vmem:[%s3070_s6 + $0x58] sm:$0xff] }
 0x262   : > { %1818 = vlog2.f32 %v1296_v27  ;;  %v1298_v62 = vsel %vm3113_vm9, %v1270_v2, 1.0  ;;  %vm3185_vm10 = vmand %vm1238_vm5, %vm1174_vm3  ;;  %vm1192_vm9 = vcmp.gt.f32.partialorder %v3060_v16, 0.0  ;;  %v1282_v16 = vmul.f32 %v1813_v42, %v3080_v60 }
 0x263   : > { %1820 = vlog2.f32 %v1295_v54  ;;  %v3161_v20 = vpop.xlane.xlu0 %1044  ;;  %v1630_v45 = vsel %vm3185_vm10, 1.0, %v3612_v23  ;;  %vm3211_vm3 = vmand %vm1192_vm9, %vm1224_vm4  ;;  %vm1178_vm9 = vcmp.lt.s32.totalorder %v2726_v10, 256 }
 0x264   : > { %1822 = vlog2.f32 %v1297_v38  ;;  %v3167_v19 = vpop.xlane.xlu1 %1047  ;;  %vm3221_vm5 = vmand %vm3195_vm6, %vm1175_vm0  ;;  %v1445_v12 = vsel %vm1359_vm12, %v1630_v45, 0.0 }
 0x265   : > { %1824 = vrcp.f32 %v3106_v41  ;;  %vm3242_vm11 = vmand %vm3211_vm3, %vm1176_vm13  ;;  %v1303_v29 = vsel %vm3221_vm5, %v1280_v25, 1.0  ;;  %v1631_v21 = vsel %vm3221_vm5, 1.0, %v3612_v23  ;;  %v1446_v3 = vadd.f32 %v1445_v12, %v1444_v52 }
 0x266   : > { %1826 = vlog2.f32 %v1298_v62  ;;  %v1304_v49 = vsel %vm3242_vm11, %v1282_v16, 1.0  ;;  %v1632_v38 = vsel %vm3242_vm11, 1.0, %v3612_v23  ;;  %v1447_v30 = vsel %vm1359_vm12, %v1631_v21, 0.0  ;;  %v1211_v62 = vld [vmem:[%s3070_s6 + $0x60] sm:$0xff] }
 0x267   : > { %v944_v4 = vpop.xlane.xlu0 %943  ;;  %1828 = vrcp.f32 %v3109_v15  ;;  %v1448_v50 = vadd.f32 %v1447_v30, %v1446_v3  ;;  %v1449_v42 = vsel %vm1359_vm12, %v1632_v38, 0.0  ;;  %vm1179_vm13 = vcmp.lt.s32.totalorder %v2797_v33, 256  ;;  %v1213_v3 = vld [vmem:[%s3070_s6 + $0x70] sm:$0xff] }
 0x268   : > { %v3182_v26 = vpop.xlane.xlu1 %946  ;;  %vm1180_vm5 = vcmp.lt.s32.totalorder %v2802_v24, 256 }
 0x26a   : > { %v1815_v46 = vpop.eup %1814 }
 0x26b   : > { %v1817_v47 = vpop.eup %1816  ;;  %v1272_v41 = vmul.f32 %v1815_v46, %v3125_v43  ;;  %v1027_v8 = vpop.xlane.xlu0 %1026 }
 0x26c   : > { %v1819_v40 = vpop.eup %1818  ;;  %v1274_v32 = vmul.f32 %v1817_v47, %v944_v4  ;;  %1830 = vrcp.f32 %v1027_v8  ;;  %v1030_v13 = vpop.xlane.xlu1 %1029 }
 0x26d   : > { %v1821_v55 = vpop.eup %1820  ;;  %v1299_v43 = vsel %vm3135_vm8, %v1272_v41, 1.0  ;;  %1832 = vrcp.f32 %v1030_v13  ;;  %vm3232_vm8 = vmand %vm1193_vm1, %vm1225_vm2  ;;  %v1314_v31 = vmul.f32 0.6931472, %v1819_v40  ;;  %vm1227_vm1 = vcmp.ge.f32.partialorder %v1211_v62, 0.5 }
 0x26e   : > { %v1823_v63 = vpop.eup %1822  ;;  %1834 = vlog2.f32 %v1299_v43  ;;  %v1300_v37 = vsel %vm3151_vm7, %v1274_v32, 1.0  ;;  %v1312_v0 = vmul.f32 0.6931472, %v1821_v55  ;;  %vm1226_vm7 = vcmp.ge.f32.partialorder %v1210_v39, 0.5  ;;  %vm3256_vm0 = vmand %vm3232_vm8, %vm1177_vm14 }
 0x26f   : > { %v1051_v27 = vpop.xlane.xlu0 %1050  ;;  %1836 = vlog2.f32 %v1300_v37  ;;  %v1316_v54 = vmul.f32 0.6931472, %v1823_v63  ;;  %v1825_v53 = vpop.eup %1824  ;;  %v1344_v14 = vsub.f32 0.0, %v1314_v31  ;;  %v1633_v57 = vsel %vm3256_vm0, 1.0, %v3612_v23 }
 0x270   : > { %v959_v9 = vpop.xlane.xlu1 %958  ;;  %1838 = vrcp.f32 %v3161_v20  ;;  %v1827_v2 = vpop.eup %1826  ;;  %v1343_v20 = vsub.f32 0.0, %v1312_v0  ;;  %v1450_v31 = vadd.f32 %v1449_v42, %v1448_v50  ;;  %v1451_v39 = vsel %vm1359_vm12, %v1633_v57, 0.0 }
 0x271   : > { %1840 = vlog2.f32 %v1303_v29  ;;  %v1829_v22 = vpop.eup %1828  ;;  %v1345_v17 = vsub.f32 0.0, %v1316_v54  ;;  %v1284_v11 = vmul.f32 %v1825_v53, %v959_v9  ;;  %v1361_v5 = vsel %vm1359_vm12, %v1344_v14, 0.0  ;;  %v1214_v14 = vld [vmem:[%s3070_s6 + $0x78] sm:$0xff] }
 0x272   : > { %1842 = vlog2.f32 %v1304_v49  ;;  %v1318_v7 = vmul.f32 0.6931472, %v1827_v2  ;;  %v1360_v40 = vsel %vm1359_vm12, %v1343_v20, 0.0  ;;  %vm1228_vm8 = vcmp.ge.f32.partialorder %v1212_v6, 0.5 }
 0x273   : > { %v1154_v48 = vpop.xlane.xlu0 %1153  ;;  %1844 = vrcp.f32 %v3167_v19  ;;  %v1305_v55 = vsel %vm3256_vm0, %v1284_v11, 1.0  ;;  %v1362_v44 = vadd.f32 %v1361_v5, %v1360_v40  ;;  %v1452_v2 = vadd.f32 %v1451_v39, %v1450_v31 }
 0x274   : > { %vm1194_vm4 = vcmp.gt.f32.partialorder %v1154_v48, 0.0  ;;  %v962_v34 = vpop.xlane.xlu1 %961  ;;  %1846 = vrcp.f32 %v1051_v27  ;;  %v1346_v43 = vsub.f32 0.0, %v1318_v7  ;;  %vm1181_vm0 = vcmp.lt.s32.totalorder %v2858_v59, 256 }
 0x275   : > { %vm3266_vm6 = vmand %vm1194_vm4, %vm1226_vm7  ;;  %v1286_v35 = vmul.f32 %v1829_v22, %v962_v34  ;;  %vm1229_vm4 = vcmp.ge.f32.partialorder %v1213_v3, 0.5 }
 0x276   : > { %v1831_v4 = vpop.eup %1830  ;;  %vm3283_vm2 = vmand %vm3266_vm6, %vm1178_vm9  ;;  %v1365_v29 = vsel %vm1359_vm12, %v1346_v43, 0.0  ;;  %vm1182_vm9 = vcmp.lt.s32.totalorder %v2945_v58, 256  ;;  %vm1230_vm6 = vcmp.ge.f32.partialorder %v1214_v14, 0.5 }
 0x277   : > { %v1833_v46 = vpop.eup %1832  ;;  %v1276_v47 = vmul.f32 %v1831_v4, %v3182_v26  ;;  %v950_v41 = vpop.xlane.xlu0 %949  ;;  %v1363_v26 = vsel %vm1359_vm12, %v1345_v17, 0.0  ;;  %v1306_v61 = vsel %vm3283_vm2, %v1286_v35, 1.0  ;;  %v1634_v21 = vsel %vm3283_vm2, 1.0, %v3612_v23 }
 0x278   : > { %v1835_v8 = vpop.eup %1834  ;;  %v1278_v19 = vmul.f32 %v1833_v46, %v950_v41  ;;  %v965_v25 = vpop.xlane.xlu1 %964  ;;  %v1364_v37 = vadd.f32 %v1363_v26, %v1362_v44  ;;  %v1453_v17 = vsel %vm1359_vm12, %v1634_v21, 0.0 }
 0x279   : > { %v1320_v32 = vmul.f32 0.6931472, %v1835_v8  ;;  %v1301_v13 = vsel %vm3173_vm15, %v1276_v47, 1.0  ;;  %v1837_v10 = vpop.eup %1836  ;;  %v1454_v5 = vadd.f32 %v1453_v17, %v1452_v2 }
 0x27a   : > { %1848 = vlog2.f32 %v1301_v13  ;;  %v1302_v15 = vsel %vm3185_vm10, %v1278_v19, 1.0  ;;  %v1839_v16 = vpop.eup %1838  ;;  %v1322_v51 = vmul.f32 0.6931472, %v1837_v10  ;;  %v1366_v28 = vadd.f32 %v1365_v29, %v1364_v37 }
 0x27b   : > { %v1347_v63 = vsub.f32 0.0, %v1320_v32  ;;  %1850 = vlog2.f32 %v1302_v15  ;;  %v1157_v52 = vpop.xlane.xlu0 %1156  ;;  %v1841_v36 = vpop.eup %1840  ;;  %v1288_v27 = vmul.f32 %v1839_v16, %v965_v25 }
 0x27c   : > { %1852 = vlog2.f32 %v1305_v55  ;;  %vm1195_vm15 = vcmp.gt.f32.partialorder %v1157_v52, 0.0  ;;  %v1054_v12 = vpop.xlane.xlu1 %1053  ;;  %v1843_v0 = vpop.eup %1842  ;;  %v3315_v53 = vmul.f32 0.6931472, %v1841_v36  ;;  %v1348_v48 = vsub.f32 0.0, %v1322_v51 }
 0x27d   : > { %vm1243_vm10 = vmand %vm1195_vm15, %vm1227_vm1  ;;  %1854 = vrcp.f32 %v1054_v12  ;;  %v1367_v9 = vsel %vm1359_vm12, %v1347_v63, 0.0  ;;  %v1845_v49 = vpop.eup %1844  ;;  %v1330_v41 = vmul.f32 0.6931472, %v1843_v0 }
 0x27e   : > { %1856 = vlog2.f32 %v1306_v61  ;;  %vm3302_vm3 = vmand %vm1243_vm10, %vm1179_vm13  ;;  %v1847_v34 = vpop.eup %1846  ;;  %v1368_v22 = vadd.f32 %v1367_v9, %v1366_v28  ;;  %v1351_v57 = vsub.f32 0.0, %v3315_v53  ;;  %v1369_v46 = vsel %vm1359_vm12, %v1348_v48, 0.0 }
 0x27f   : > { %v1307_v33 = vsel %vm3302_vm3, %v1288_v27, 1.0  ;;  %v1160_v54 = vpop.xlane.xlu0 %1159  ;;  %v1635_v30 = vsel %vm3302_vm3, 1.0, %v3612_v23  ;;  %v1352_v16 = vsub.f32 0.0, %v1330_v41 }
 0x280   : > { %1858 = vlog2.f32 %v1307_v33  ;;  %vm1196_vm14 = vcmp.gt.f32.partialorder %v1160_v54, 0.0  ;;  %v968_v38 = vpop.xlane.xlu1 %967  ;;  %v1455_v50 = vsel %vm1359_vm12, %v1635_v30, 0.0  ;;  %v1370_v8 = vadd.f32 %v1369_v46, %v1368_v22 }
 0x281   : > { %vm1244_vm11 = vmand %vm1196_vm14, %vm1228_vm8  ;;  %v1290_v20 = vmul.f32 %v1845_v49, %v968_v38  ;;  %v1456_v26 = vadd.f32 %v1455_v50, %v1454_v5  ;;  %v1375_v0 = vsel %vm1359_vm12, %v1351_v57, 0.0  ;;  %v1377_v3 = vsel %vm1359_vm12, %v1352_v16, 0.0 }
 0x282   : > { %vm1260_vm7 = vmand %vm1244_vm11, %vm1180_vm5  ;;  %vm1475_vm5 = vcmp.eq.s32.totalorder %v2279_v1, 1  ;;  %vm1473_vm8 = vcmp.eq.s32.totalorder %v2279_v1, 0 }
 0x283   : > { %v1636_v11 = vsel %vm1260_vm7, 1.0, %v3612_v23  ;;  %v1308_v18 = vsel %vm1260_vm7, %v1290_v20, 1.0  ;;  %v1163_v62 = vpop.xlane.xlu0 %1162 }
 0x284   : > { %v1849_v4 = vpop.eup %1848  ;;  %1860 = vlog2.f32 %v1308_v18  ;;  %vm1197_vm2 = vcmp.gt.f32.partialorder %v1163_v62, 0.0  ;;  %v971_v42 = vpop.xlane.xlu1 %970  ;;  %v1457_v45 = vsel %vm1359_vm12, %v1636_v11, 0.0 }
 0x285   : > { %v1851_v24 = vpop.eup %1850  ;;  %v1324_v7 = vmul.f32 0.6931472, %v1849_v4  ;;  %vm1245_vm1 = vmand %vm1197_vm2, %vm1229_vm4  ;;  %v1292_v47 = vmul.f32 %v1847_v34, %v971_v42  ;;  %v1458_v52 = vadd.f32 %v1457_v45, %v1456_v26 }
 0x286   : > { %v1853_v35 = vpop.eup %1852  ;;  %v1326_v40 = vmul.f32 0.6931472, %v1851_v24  ;;  %vm1261_vm13 = vmand %vm1245_vm1, %vm1181_vm0 }
 0x287   : > { %v1855_v19 = vpop.eup %1854  ;;  %v1349_v25 = vsub.f32 0.0, %v1324_v7  ;;  %v1637_v32 = vsel %vm1261_vm13, 1.0, %v3612_v23  ;;  %v1309_v13 = vsel %vm1261_vm13, %v1292_v47, 1.0  ;;  %v1166_v55 = vpop.xlane.xlu0 %1165  ;;  %v1332_v63 = vmul.f32 0.6931472, %v1853_v35 }
 0x288   : > { %v1857_v10 = vpop.eup %1856  ;;  %v1350_v44 = vsub.f32 0.0, %v1326_v40  ;;  %1862 = vlog2.f32 %v1309_v13  ;;  %vm1198_vm15 = vcmp.gt.f32.partialorder %v1166_v55, 0.0  ;;  %v974_v15 = vpop.xlane.xlu1 %973  ;;  %v1459_v43 = vsel %vm1359_vm12, %v1637_v32, 0.0 }
 0x289   : > { %v1371_v61 = vsel %vm1359_vm12, %v1349_v25, 0.0  ;;  %vm1246_vm10 = vmand %vm1198_vm15, %vm1230_vm6  ;;  %v1294_v59 = vmul.f32 %v1855_v19, %v974_v15  ;;  %v1334_v36 = vmul.f32 0.6931472, %v1857_v10  ;;  %v1460_v27 = vadd.f32 %v1459_v43, %v1458_v52 }
 0x28a   : > { %v1859_v6 = vpop.eup %1858  ;;  %v1372_v37 = vadd.f32 %v1371_v61, %v1370_v8  ;;  %v1373_v12 = vsel %vm1359_vm12, %v1350_v44, 0.0  ;;  %vm1262_vm3 = vmand %vm1246_vm10, %vm1182_vm9  ;;  %v1353_v29 = vsub.f32 0.0, %v1332_v63 }
 0x28b   : > { %v1310_v31 = vsel %vm1262_vm3, %v1294_v59, 1.0  ;;  %v1638_v51 = vsel %vm1262_vm3, 1.0, %v3612_v23  ;;  %v1336_v9 = vmul.f32 0.6931472, %v1859_v6  ;;  %v1354_v58 = vsub.f32 0.0, %v1334_v36 }
 0x28c   : > { %v1374_v39 = vadd.f32 %v1373_v12, %v1372_v37  ;;  %1864 = vlog2.f32 %v1310_v31  ;;  %v1461_v60 = vsel %vm1359_vm12, %v1638_v51, 0.0  ;;  %v1379_v23 = vsel %vm1359_vm12, %v1353_v29, 0.0 }
 0x28d   : > { %v1462_v21 = vadd.f32 %v1461_v60, %v1460_v27  ;;  %v1355_v28 = vsub.f32 0.0, %v1336_v9  ;;  %v1381_v48 = vsel %vm1359_vm12, %v1354_v58, 0.0 }
 0x28e   : > { %v1861_v33 = vpop.eup %1860  ;;  %v1376_v54 = vadd.f32 %v1375_v0, %v1374_v39 }
 0x28f   : > { %v1338_v49 = vmul.f32 0.6931472, %v1861_v33  ;;  %1463 = vadd.xlane.f32.xlu1 %v1462_v21  ;;  %v1383_v22 = vsel %vm1359_vm12, %v1355_v28, 0.0 }
 0x290   : > { %v1378_v53 = vadd.f32 %v1377_v3, %v1376_v54 }
 0x291   : > { %v1356_v2 = vsub.f32 0.0, %v1338_v49 }
 0x292   : > { %v1863_v38 = vpop.eup %1862  ;;  %v1380_v14 = vadd.f32 %v1379_v23, %v1378_v53 }
 0x293   : > { %v1340_v30 = vmul.f32 0.6931472, %v1863_v38  ;;  %v1385_v62 = vsel %vm1359_vm12, %v1356_v2, 0.0 }
 0x294   : > { %v1382_v20 = vadd.f32 %v1381_v48, %v1380_v14 }
 0x295   : > { %v1357_v34 = vsub.f32 0.0, %v1340_v30 }
 0x296   : > { %v1865_v17 = vpop.eup %1864  ;;  %v1384_v11 = vadd.f32 %v1383_v22, %v1382_v20 }
 0x297   : > { %v1342_v18 = vmul.f32 0.6931472, %v1865_v17  ;;  %v1387_v50 = vsel %vm1359_vm12, %v1357_v34, 0.0 }
 0x298   : > { %v1386_v4 = vadd.f32 %v1385_v62, %v1384_v11 }
 0x299   : > { %v1358_v57 = vsub.f32 0.0, %v1342_v18 }
 0x29a   : > { %v1388_v42 = vadd.f32 %v1387_v50, %v1386_v4 }
 0x29b   : > { %v1389_v24 = vsel %vm1359_vm12, %v1358_v57, 0.0  ;;  %vm1472_vm12 = vcmp.eq.s32.totalorder %v2268_v56, 0 }
 0x29c   : > { %v1390_v46 = vadd.f32 %v1389_v24, %v1388_v42  ;;  %vm1476_vm14 = vmand %vm1472_vm12, %vm1475_vm5 }
 0x29d   : > { %vm1474_vm11 = vmand %vm1472_vm12, %vm1473_vm8 }
 0x29e   : > { %1391 = vadd.xlane.f32.xlu0 %v1390_v46 }
 0x31c   : > { %v1464_v5 = vpop.xlane.xlu1 %1463 }
 0x31d   : > { %v1465_v7 = vrot.slane %v1464_v5, 4 }
 0x31f   : > { %v1466_v47 = vadd.f32 %v1465_v7, %v1464_v5 }
 0x321   : > { %v1467_v35 = vrot.slane %v1466_v47, 2 }
 0x323   : > { %v1468_v45 = vadd.f32 %v1467_v35, %v1466_v47 }
 0x325   : > { %v1469_v26 = vrot.slane %v1468_v45, 1 }
 0x327   : > { %v1470_v55 = vadd.f32 %v1469_v26, %v1468_v45 }
 0x32b   : > { %v1392_v41 = vpop.xlane.xlu0 %1391 }
 0x32c   : > { %v1393_v8 = vrot.slane %v1392_v41, 4 }
 0x32e   : > { %v1394_v40 = vadd.f32 %v1393_v8, %v1392_v41 }
 0x330   : > { %v1395_v19 = vrot.slane %v1394_v40, 2 }
 0x332   : > { %v1396_v25 = vadd.f32 %v1395_v19, %v1394_v40 }
 0x334   : > { %v1397_v32 = vrot.slane %v1396_v25, 1 }
 0x336   : > { %v1398_v13 = vadd.f32 %v1397_v32, %v1396_v25 }
 0x338   : > { %1691 = vpush %v1398_v13 }
 0x339   : > { %1693 = vpush %v1470_v55 }
 0x369   : > { %s1692_s8 = spop %1691 }
 0x36a   : > { %v1479_v10 = vstv %s1692_s8  ;;  %s1694_s12 = spop %1693 }
 0x36b   : > { %v1477_v44 = vstv %s1694_s12 }
 0x36c   : > { %v1478_v15 = vsel %vm1476_vm14, %v1477_v44, 0.0 }
 0x36d   : > { %v1480_v56 = vsel %vm1474_vm11, %v1479_v10, %v1478_v15 }
 0x36e   : > { %1481 = vst [vmem:[%s250_s9] sm:$0xff] %v1480_v56 }
 0x36f   : > { %1879 = shalt.err (!%p1876_p3)
}
 0x370   : > { %s1880_s23 = scalar_lea.hbm %s3361_s15, 128  ;;  %s1884_s11 = scalar_lea.hbm %s3408_s5, 256 }
 0x371   : > { %p1881_p4 = scmp.ne.s32.totalorder %s3361_s15, %s1880_s23  ;;  %p1885_p9 = scmp.lt.u32.totalorder %s3361_s15, %s3408_s5 }
 0x372   : > { %p1886_p10 = scmp.lt.u32.totalorder %s1884_s11, %s1880_s23  ;;  %p1888_p12 = scmp.lt.u32.totalorder %s1880_s23, %s3361_s15 }
 0x373   : > { %p1882_p7 = pnand %p1881_p4, %p2001_p5 }
 0x374   : > { %p1887_p11 = por %p1886_p10, %p1885_p9 }
 0x375   : > { %p1883_p8 = pneg %p1882_p7 }
 0x376   : > { %p1889_p13 = por %p1888_p12, %p1887_p11 }
 0x378   : > { %p1890_p0 = pnand %p1889_p13, %p1883_p8 }
 0x37a   : > { %1893 = shalt.err (!%p1890_p0)
}
 0x37b   : > { %1695 = dma.vmem_to_hbm [thread:$0]  (%p2001_p5), %s3363_s10, 128, %s3361_s15, %s1483_s16  }
 0x37c PF: > { %p1701_p1 = scmp.ge.s32.totalorder %s1928_s21, 2  ;;  %s1508_s9 = sand.u32 1, %s1916_s18  }
 0x37d   : > { %s1509_s12 = scalar_lea.sflag [#allocation3], %s1508_s9 }
 0x37e   : > { %p1698_p2 = pnand %p1701_p1, %p2005_p6 }
 0x380   : > { %1911 = dma.done.wait (!%p1698_p2), %s1509_s12, 128  }
 0x381   : > { %1913 = vsyncadd (!%p1698_p2), %s1509_s12, 4294967168  ;;  %p15_p3 = scmp.ge.s32.totalorder %s1988_s24, 4   ;;  %s3665_s18 = smov %s1920_s19 }
 0x382   : > { %s3666_s19 = smov %s1924_s20  ;;  %s3667_s20 = smov %s1999_s27 }
 0x383   : > { %s3668_s21 = smov %s1988_s24  ;;  %17 = sbr.rel (!%p15_p3) target bundleno = 3 (0x3), region = 81 }
 0x38a   :  { %1514 = vsyncpa [#allocation3], 1 }
 0x38b   :  { %1516 = vsyncpa [#allocation3 + $0x1], 1 }

</bundles_post_ra>
